<compile_context>
chip_gen: v7x
topology: tpu7x:2x2x1
jax: 0.10.0
libtpu: 0.0.40
codegen_flags: <defaults>
</compile_context>

<pallas_src>
import functools

import jax
import jax.numpy as jnp
from jax.experimental import pallas as pl
from jax.experimental.pallas import tpu as pltpu


def _lstm_gates(gates, c):
    """PyTorch LSTMCell nonlinearity; gates is (B, 4H) with [i|f|g|o] lanes.

    sigmoid/tanh are applied once to the whole gates vreg (2 EUP pushes
    instead of 4 quarter-vreg ones); individual gates are then cheap lane
    slices of the already-activated values.
    """
    H = gates.shape[1] // 4
    sg = jax.nn.sigmoid(gates)
    th = jnp.tanh(gates)
    i_g = sg[:, 0 * H:1 * H]
    f_g = sg[:, 1 * H:2 * H]
    g_g = th[:, 2 * H:3 * H]
    o_g = sg[:, 3 * H:4 * H]
    c_new = f_g * c + i_g * g_g
    h_new = o_g * jnp.tanh(c_new)
    return h_new, c_new


def decoder_kernel(max_len,
                   key_ref, value_ref,
                   w1_step_ref, w1_cat_ref, b1_ref,
                   w2_cat_ref, b2_ref,
                   wq_ref, wc_ref, bo_ref,
                   pred_ref, attn_ref):
    key = key_ref[...]          # (Bg, T, D)
    value = value_ref[...]      # (Bg, T, D)
    Bg, T, D = key.shape
    H = w1_cat_ref.shape[0] - D

    w1_step = w1_step_ref[...]  # (1, 4H)   weight rows for the scalar `step` input
    w1_cat = w1_cat_ref[...]    # (D+H, 4H) = [W_ih(context) ; W_hh] stacked
    b1 = b1_ref[...]            # (1, 4H)   (b_ih + b_hh)
    w2_cat = w2_cat_ref[...]    # (H+D, 4D) = [W_ih ; W_hh] stacked
    b2 = b2_ref[...]            # (1, 4D)
    wq = wq_ref[...]            # (1, D)    linear_out weight for query half
    wc = wc_ref[...]            # (1, D)    linear_out weight for context half
    bo = bo_ref[...]            # (1, 1)

    # Pre-scale key by 1/sqrt(d_k) once instead of scaling energy every step.
    # Off the serial recurrence critical path -> hidden under the first LSTM step.
    key_s = key * (float(D) ** -0.5)

    # hidden_states = [None, None] -> zero-initialized (h, c)
    h1 = jnp.zeros((Bg, H), jnp.float32)
    c1 = jnp.zeros((Bg, H), jnp.float32)
    h2 = jnp.zeros((Bg, D), jnp.float32)
    c2 = jnp.zeros((Bg, D), jnp.float32)
    context = value[:, 0, :]                 # context = value[:, 0, :]
    step = jnp.zeros((Bg, 1), jnp.float32)   # eval-mode: prediction init = 0

    preds = []
    attn_rows = []

    for i in range(max_len):  # short serial chain -> fully unrolled
        # LSTM1( cat([step, context]) ): rank-1 `step` contribution done on the
        # VPU (no K=1 MXU round-trip); context + h1 contributions fused into
        # ONE MXU dot via the stacked weight.
        x1 = jnp.concatenate([context, h1], axis=1)                  # (Bg, D+H)
        gates1 = (step * w1_step
                  + jnp.dot(x1, w1_cat, preferred_element_type=jnp.float32)
                  + b1)                                              # (Bg, 4H)
        h1, c1 = _lstm_gates(gates1, c1)

        # LSTM2(h1): input + hidden contributions fused into ONE MXU dot.
        x2 = jnp.concatenate([h1, h2], axis=1)                       # (Bg, H+D)
        gates2 = jnp.dot(x2, w2_cat, preferred_element_type=jnp.float32) + b2
        h2, c2 = _lstm_gates(gates2, c2)
        query = h2                                                   # (Bg, D)

        # Attention: shapes are MXU-hostile -> VPU broadcast-mul + XLU reduce.
        energy = jnp.sum(key_s * query[:, None, :], axis=2)          # (Bg, T)
        m = jnp.max(energy, axis=1, keepdims=True)
        e = jnp.exp(energy - m)
        denom = jnp.sum(e, axis=1, keepdims=True)
        attn = e * pl.reciprocal(denom, approx=False)                # (Bg, T)
        context = jnp.sum(attn[:, :, None] * value, axis=1)          # (Bg, D)

        # linear_out( cat([query, context]) ): one VPU mul + lane reduce
        # instead of two N=1 MXU matmuls.
        pred = jnp.sum(query * wq + context * wc, axis=1, keepdims=True) + bo

        preds.append(pred)
        attn_rows.append(attn[0:1, :])     # attention_plot.append(attention[0])
        step = pred                        # eval-mode: feed back prediction

    # Single lane-dense store at the end instead of per-step masked writes.
    pred_ref[...] = jnp.concatenate(preds, axis=1)                   # (Bg, max_len)
    attn_ref[...] = jnp.concatenate(attn_rows, axis=0)[None]         # (1, max_len, T)


def decoder_forward(key, value, params, max_len=3):
    B, T, D = key.shape
    H = params['w1_hh'].shape[0]

    # Pad batch to a multiple of 8 (f32 sublane count) so the VPU/EUP ops on
    # the serial path run on full sublanes; padded rows are independent and
    # sliced off afterwards.
    Bg = 8
    G = -(-B // Bg)                 # number of 8-row batch groups
    B_pad = G * Bg
    if B_pad != B:
        pad = ((0, B_pad - B), (0, 0), (0, 0))
        key = jnp.pad(key, pad)
        value = jnp.pad(value, pad)

    # Fuse per-cell input/hidden weights so each LSTM cell is one MXU dot/step.
    w1_cat = jnp.concatenate([params['w1_ctx'], params['w1_hh']], axis=0)  # (D+H, 4H)
    w2_cat = jnp.concatenate([params['w2_ih'], params['w2_hh']], axis=0)   # (H+D, 4D)
    wq_row = params['wq'].T   # (1, D)
    wc_row = params['wc'].T   # (1, D)

    weights = (params['w1_step'], w1_cat, params['b1'],
               w2_cat, params['b2'], wq_row, wc_row, params['bo'])

    kernel = functools.partial(decoder_kernel, max_len)
    full = lambda a: pl.BlockSpec(a.shape, lambda g: (0,) * a.ndim)

    preds, attns = pl.pallas_call(
        kernel,
        out_shape=(jax.ShapeDtypeStruct((B_pad, max_len), jnp.float32),
                   jax.ShapeDtypeStruct((G, max_len, T), jnp.float32)),
        grid=(G,),
        in_specs=[pl.BlockSpec((Bg, T, D), lambda g: (g, 0, 0)),
                  pl.BlockSpec((Bg, T, D), lambda g: (g, 0, 0))]
                 + [full(w) for w in weights],
        out_specs=(pl.BlockSpec((Bg, max_len), lambda g: (g, 0)),
                   pl.BlockSpec((1, max_len, T), lambda g: (g, 0, 0))),
        compiler_params=pltpu.CompilerParams(
            dimension_semantics=("parallel",)),   # lets v7x use both TCs once B >= 16
    )(key, value, *weights)

    # Global batch row 0 lives in group 0 -> that group's attention log.
    return preds[:B], attns[0]


def init_params(rng, decoder_hidden_dim, key_value_size):
    """Deterministic synthetic init matching the PyTorch parameter shapes."""
    H, D = decoder_hidden_dim, key_value_size
    ks = jax.random.split(rng, 10)
    s1 = 1.0 / jnp.sqrt(jnp.float32(H))
    s2 = 1.0 / jnp.sqrt(jnp.float32(D))
    u = lambda k, shape, s: jax.random.uniform(k, shape, jnp.float32, -s, s)

    # LSTMCell(1 + D -> H): weight_ih (4H, 1+D), weight_hh (4H, H), biases (4H,)
    w1_ih_t = u(ks[0], (1 + D, 4 * H), s1)
    w1_hh_t = u(ks[1], (H, 4 * H), s1)
    b1 = (u(ks[2], (1, 4 * H), s1) + u(ks[3], (1, 4 * H), s1))  # b_ih + b_hh
    # LSTMCell(H -> D): weight_ih (4D, H), weight_hh (4D, D), biases (4D,)
    w2_ih_t = u(ks[4], (H, 4 * D), s2)
    w2_hh_t = u(ks[5], (D, 4 * D), s2)
    b2 = (u(ks[6], (1, 4 * D), s2) + u(ks[7], (1, 4 * D), s2))
    # Linear(2D -> 1): weight (1, 2D), bias (1,)
    s3 = 1.0 / jnp.sqrt(jnp.float32(2 * D))
    w_out = u(ks[8], (1, 2 * D), s3)
    b_out = u(ks[9], (1, 1), s3)

    return dict(
        w1_step=w1_ih_t[0:1, :], w1_ctx=w1_ih_t[1:, :], w1_hh=w1_hh_t, b1=b1,
        w2_ih=w2_ih_t, w2_hh=w2_hh_t, b2=b2,
        wq=w_out[:, :D].T, wc=w_out[:, D:].T, bo=b_out,
    )


def decoder_ref(key, value, params, max_len=3):
    """Pure-JAX reference mirroring the PyTorch eval-mode forward."""
    B, T, D = key.shape
    H = params['w1_hh'].shape[0]
    h1 = jnp.zeros((B, H)); c1 = jnp.zeros((B, H))
    h2 = jnp.zeros((B, D)); c2 = jnp.zeros((B, D))
    context = value[:, 0, :]
    step = jnp.zeros((B, 1))
    preds, attns = [], []
    for _ in range(max_len):
        g1 = (step @ params['w1_step'] + context @ params['w1_ctx']
              + h1 @ params['w1_hh'] + params['b1'])
        ii, ff, gg, oo = jnp.split(g1, 4, axis=1)
        c1 = jax.nn.sigmoid(ff) * c1 + jax.nn.sigmoid(ii) * jnp.tanh(gg)
        h1 = jax.nn.sigmoid(oo) * jnp.tanh(c1)
        g2 = h1 @ params['w2_ih'] + h2 @ params['w2_hh'] + params['b2']
        ii, ff, gg, oo = jnp.split(g2, 4, axis=1)
        c2 = jax.nn.sigmoid(ff) * c2 + jax.nn.sigmoid(ii) * jnp.tanh(gg)
        h2 = jax.nn.sigmoid(oo) * jnp.tanh(c2)
        query = h2
        energy = jnp.einsum('btd,bd->bt', key, query) / jnp.sqrt(jnp.float32(D))
        attn = jax.nn.softmax(energy, axis=1)
        context = jnp.einsum('bt,btd->bd', attn, value)
        pred = query @ params['wq'] + context @ params['wc'] + params['bo']
        preds.append(pred)
        attns.append(attn[0])
        step = pred
    return jnp.concatenate(preds, axis=1), jnp.stack(attns, axis=0)


if __name__ == "__main__":
    B, T = 2, 8
    decoder_hidden_dim = 32
    key_value_size = 32
    max_len = 3  # eval-mode path of the PyTorch forward

    root = jax.random.PRNGKey(0)
    k_key, k_val, k_par = jax.random.split(root, 3)
    key = jax.random.normal(k_key, (B, T, key_value_size), jnp.float32)
    value = jax.random.normal(k_val, (B, T, key_value_size), jnp.float32)
    params = init_params(k_par, decoder_hidden_dim, key_value_size)

    preds, attns = decoder_forward(key, value, params, max_len=max_len)
    preds = jax.block_until_ready(preds)
    attns = jax.block_until_ready(attns)

    ref_preds, ref_attns = decoder_ref(key, value, params, max_len=max_len)
    assert preds.shape == (B, max_len), preds.shape        # predictions.squeeze()
    assert attns.shape == (max_len, T), attns.shape        # stacked attention[0]
    assert jnp.allclose(preds, ref_preds, atol=1e-4, rtol=1e-4)
    assert jnp.allclose(attns, ref_attns, atol=1e-4, rtol=1e-4)

    print("KERNEL_OK")
</pallas_src>

<mosaic_0001>
module attributes {stable_mosaic.version = 11 : i64} {
  func.func @decoder_kernel(%arg0: i32, %arg1: memref<8x8x32xf32, #tpu.memory_space<vmem>>, %arg2: memref<8x8x32xf32, #tpu.memory_space<vmem>>, %arg3: memref<1x128xf32, #tpu.memory_space<vmem>>, %arg4: memref<64x128xf32, #tpu.memory_space<vmem>>, %arg5: memref<1x128xf32, #tpu.memory_space<vmem>>, %arg6: memref<64x128xf32, #tpu.memory_space<vmem>>, %arg7: memref<1x128xf32, #tpu.memory_space<vmem>>, %arg8: memref<1x32xf32, #tpu.memory_space<vmem>>, %arg9: memref<1x32xf32, #tpu.memory_space<vmem>>, %arg10: memref<1x1xf32, #tpu.memory_space<vmem>>, %arg11: memref<8x3xf32, #tpu.memory_space<vmem>>, %arg12: memref<1x3x8xf32, #tpu.memory_space<vmem>>) attributes {dimension_semantics = [#tpu.dimension_semantics<parallel>], iteration_bounds = array<i64: 1>, scalar_prefetch = 0 : i64, scratch_operands = 0 : i64, tpu.core_type = #tpu.core_type<tc>, window_params = [{transform_indices = @transform_0, window_bounds = array<i64: 8, 8, 32>}, {transform_indices = @transform_1, window_bounds = array<i64: 8, 8, 32>}, {pipeline_mode = #tpu.pipeline_mode<synchronous>, transform_indices = @transform_2, window_bounds = array<i64: 1, 128>}, {pipeline_mode = #tpu.pipeline_mode<synchronous>, transform_indices = @transform_3, window_bounds = array<i64: 64, 128>}, {pipeline_mode = #tpu.pipeline_mode<synchronous>, transform_indices = @transform_4, window_bounds = array<i64: 1, 128>}, {pipeline_mode = #tpu.pipeline_mode<synchronous>, transform_indices = @transform_5, window_bounds = array<i64: 64, 128>}, {pipeline_mode = #tpu.pipeline_mode<synchronous>, transform_indices = @transform_6, window_bounds = array<i64: 1, 128>}, {pipeline_mode = #tpu.pipeline_mode<synchronous>, transform_indices = @transform_7, window_bounds = array<i64: 1, 32>}, {pipeline_mode = #tpu.pipeline_mode<synchronous>, transform_indices = @transform_8, window_bounds = array<i64: 1, 32>}, {pipeline_mode = #tpu.pipeline_mode<synchronous>, transform_indices = @transform_9, window_bounds = array<i64: 1, 1>}, {transform_indices = @transform_10, window_bounds = array<i64: 8, 3>}, {transform_indices = @transform_11, window_bounds = array<i64: 1, 3, 8>}]} {
    %c0 = arith.constant 0 : index
    %c0_0 = arith.constant 0 : index
    %c0_1 = arith.constant 0 : index
    %0 = vector.load %arg1[%c0, %c0_0, %c0_1] : memref<8x8x32xf32, #tpu.memory_space<vmem>>, vector<8x8x32xf32>
    %c0_2 = arith.constant 0 : index
    %c0_3 = arith.constant 0 : index
    %c0_4 = arith.constant 0 : index
    %1 = vector.load %arg2[%c0_2, %c0_3, %c0_4] : memref<8x8x32xf32, #tpu.memory_space<vmem>>, vector<8x8x32xf32>
    %c0_5 = arith.constant 0 : index
    %c0_6 = arith.constant 0 : index
    %2 = vector.load %arg3[%c0_5, %c0_6] : memref<1x128xf32, #tpu.memory_space<vmem>>, vector<1x128xf32>
    %c0_7 = arith.constant 0 : index
    %c0_8 = arith.constant 0 : index
    %3 = vector.load %arg4[%c0_7, %c0_8] : memref<64x128xf32, #tpu.memory_space<vmem>>, vector<64x128xf32>
    %c0_9 = arith.constant 0 : index
    %c0_10 = arith.constant 0 : index
    %4 = vector.load %arg5[%c0_9, %c0_10] : memref<1x128xf32, #tpu.memory_space<vmem>>, vector<1x128xf32>
    %c0_11 = arith.constant 0 : index
    %c0_12 = arith.constant 0 : index
    %5 = vector.load %arg6[%c0_11, %c0_12] : memref<64x128xf32, #tpu.memory_space<vmem>>, vector<64x128xf32>
    %c0_13 = arith.constant 0 : index
    %c0_14 = arith.constant 0 : index
    %6 = vector.load %arg7[%c0_13, %c0_14] : memref<1x128xf32, #tpu.memory_space<vmem>>, vector<1x128xf32>
    %c0_15 = arith.constant 0 : index
    %c0_16 = arith.constant 0 : index
    %7 = vector.load %arg8[%c0_15, %c0_16] : memref<1x32xf32, #tpu.memory_space<vmem>>, vector<1x32xf32>
    %c0_17 = arith.constant 0 : index
    %c0_18 = arith.constant 0 : index
    %8 = vector.load %arg9[%c0_17, %c0_18] : memref<1x32xf32, #tpu.memory_space<vmem>>, vector<1x32xf32>
    %c0_19 = arith.constant 0 : index
    %c0_20 = arith.constant 0 : index
    %9 = vector.load %arg10[%c0_19, %c0_20] : memref<1x1xf32, #tpu.memory_space<vmem>>, vector<1x1xf32>
    %cst = arith.constant 0.176776692 : f32
    %10 = vector.broadcast %cst : f32 to vector<8x8x32xf32>
    %11 = arith.mulf %0, %10 : vector<8x8x32xf32>
    %cst_21 = arith.constant 0.000000e+00 : f32
    %12 = vector.broadcast %cst_21 : f32 to vector<8x32xf32>
    %cst_22 = arith.constant 0.000000e+00 : f32
    %13 = vector.broadcast %cst_22 : f32 to vector<8x32xf32>
    %cst_23 = arith.constant 0.000000e+00 : f32
    %14 = vector.broadcast %cst_23 : f32 to vector<8x32xf32>
    %cst_24 = arith.constant 0.000000e+00 : f32
    %15 = vector.broadcast %cst_24 : f32 to vector<8x32xf32>
    %16 = vector.extract_strided_slice %1 {offsets = [0, 0, 0], sizes = [8, 1, 32], strides = [1, 1, 1]} : vector<8x8x32xf32> to vector<8x1x32xf32>
    %17 = vector.shape_cast %16 : vector<8x1x32xf32> to vector<8x32xf32>
    %cst_25 = arith.constant 0.000000e+00 : f32
    %18 = vector.broadcast %cst_25 : f32 to vector<8x1xf32>
    %19 = tpu.concatenate %17, %12 in 1 : vector<8x32xf32>, vector<8x32xf32> -> vector<8x64xf32>
    %20 = vector.broadcast %18 : vector<8x1xf32> to vector<8x128xf32>
    %21 = vector.broadcast %2 : vector<1x128xf32> to vector<8x128xf32>
    %22 = arith.mulf %20, %21 : vector<8x128xf32>
    %cst_26 = arith.constant dense<0.000000e+00> : vector<8x128xf32>
    %23 = tpu.matmul %19, %3, %cst_26 {dimension_numbers = #tpu.dot_dimension_numbers<[1], [0], [0], [1], [0, 0, 1, 1], [], []>} : vector<8x64xf32>, vector<64x128xf32>, vector<8x128xf32> -> vector<8x128xf32>
    %24 = arith.addf %22, %23 : vector<8x128xf32>
    %25 = vector.broadcast %4 : vector<1x128xf32> to vector<8x128xf32>
    %26 = arith.addf %24, %25 : vector<8x128xf32>
    %27 = arith.negf %26 : vector<8x128xf32>
    %28 = math.exp %27 : vector<8x128xf32>
    %cst_27 = arith.constant 1.000000e+00 : f32
    %29 = vector.broadcast %cst_27 : f32 to vector<8x128xf32>
    %30 = arith.addf %29, %28 : vector<8x128xf32>
    %31 = arith.divf %29, %30 : vector<8x128xf32>
    %32 = math.tanh %26 : vector<8x128xf32>
    %33 = vector.extract_strided_slice %31 {offsets = [0, 0], sizes = [8, 32], strides = [1, 1]} : vector<8x128xf32> to vector<8x32xf32>
    %34 = vector.extract_strided_slice %31 {offsets = [0, 32], sizes = [8, 32], strides = [1, 1]} : vector<8x128xf32> to vector<8x32xf32>
    %35 = vector.extract_strided_slice %32 {offsets = [0, 64], sizes = [8, 32], strides = [1, 1]} : vector<8x128xf32> to vector<8x32xf32>
    %36 = vector.extract_strided_slice %31 {offsets = [0, 96], sizes = [8, 32], strides = [1, 1]} : vector<8x128xf32> to vector<8x32xf32>
    %37 = arith.mulf %34, %13 : vector<8x32xf32>
    %38 = arith.mulf %33, %35 : vector<8x32xf32>
    %39 = arith.addf %37, %38 : vector<8x32xf32>
    %40 = math.tanh %39 : vector<8x32xf32>
    %41 = arith.mulf %36, %40 : vector<8x32xf32>
    %42 = tpu.concatenate %41, %14 in 1 : vector<8x32xf32>, vector<8x32xf32> -> vector<8x64xf32>
    %cst_28 = arith.constant dense<0.000000e+00> : vector<8x128xf32>
    %43 = tpu.matmul %42, %5, %cst_28 {dimension_numbers = #tpu.dot_dimension_numbers<[1], [0], [0], [1], [0, 0, 1, 1], [], []>} : vector<8x64xf32>, vector<64x128xf32>, vector<8x128xf32> -> vector<8x128xf32>
    %44 = vector.broadcast %6 : vector<1x128xf32> to vector<8x128xf32>
    %45 = arith.addf %43, %44 : vector<8x128xf32>
    %46 = arith.negf %45 : vector<8x128xf32>
    %47 = math.exp %46 : vector<8x128xf32>
    %cst_29 = arith.constant 1.000000e+00 : f32
    %48 = vector.broadcast %cst_29 : f32 to vector<8x128xf32>
    %49 = arith.addf %48, %47 : vector<8x128xf32>
    %50 = arith.divf %48, %49 : vector<8x128xf32>
    %51 = math.tanh %45 : vector<8x128xf32>
    %52 = vector.extract_strided_slice %50 {offsets = [0, 0], sizes = [8, 32], strides = [1, 1]} : vector<8x128xf32> to vector<8x32xf32>
    %53 = vector.extract_strided_slice %50 {offsets = [0, 32], sizes = [8, 32], strides = [1, 1]} : vector<8x128xf32> to vector<8x32xf32>
    %54 = vector.extract_strided_slice %51 {offsets = [0, 64], sizes = [8, 32], strides = [1, 1]} : vector<8x128xf32> to vector<8x32xf32>
    %55 = vector.extract_strided_slice %50 {offsets = [0, 96], sizes = [8, 32], strides = [1, 1]} : vector<8x128xf32> to vector<8x32xf32>
    %56 = arith.mulf %53, %15 : vector<8x32xf32>
    %57 = arith.mulf %52, %54 : vector<8x32xf32>
    %58 = arith.addf %56, %57 : vector<8x32xf32>
    %59 = math.tanh %58 : vector<8x32xf32>
    %60 = arith.mulf %55, %59 : vector<8x32xf32>
    %61 = vector.shape_cast %60 : vector<8x32xf32> to vector<8x1x32xf32>
    %62 = vector.broadcast %61 : vector<8x1x32xf32> to vector<8x8x32xf32>
    %63 = arith.mulf %11, %62 : vector<8x8x32xf32>
    %cst_30 = arith.constant dense<0.000000e+00> : vector<8x8xf32>
    %64 = vector.multi_reduction <add>, %63, %cst_30 [2] : vector<8x8x32xf32> to vector<8x8xf32>
    %cst_31 = arith.constant dense<0xFF800000> : vector<8xf32>
    %65 = vector.multi_reduction <maximumf>, %64, %cst_31 [1] : vector<8x8xf32> to vector<8xf32>
    %66 = vector.shape_cast %65 : vector<8xf32> to vector<8x1xf32>
    %67 = vector.broadcast %66 : vector<8x1xf32> to vector<8x8xf32>
    %68 = arith.subf %64, %67 : vector<8x8xf32>
    %69 = math.exp %68 : vector<8x8xf32>
    %cst_32 = arith.constant dense<0.000000e+00> : vector<8xf32>
    %70 = vector.multi_reduction <add>, %69, %cst_32 [1] : vector<8x8xf32> to vector<8xf32>
    %71 = vector.shape_cast %70 : vector<8xf32> to vector<8x1xf32>
    %72 = tpu.reciprocal %71 : vector<8x1xf32> -> vector<8x1xf32>
    %73 = vector.broadcast %72 : vector<8x1xf32> to vector<8x8xf32>
    %74 = arith.mulf %69, %73 : vector<8x8xf32>
    %75 = vector.shape_cast %74 : vector<8x8xf32> to vector<8x8x1xf32>
    %76 = vector.broadcast %75 : vector<8x8x1xf32> to vector<8x8x32xf32>
    %77 = arith.mulf %76, %1 : vector<8x8x32xf32>
    %cst_33 = arith.constant dense<0.000000e+00> : vector<8x32xf32>
    %78 = vector.multi_reduction <add>, %77, %cst_33 [1] : vector<8x8x32xf32> to vector<8x32xf32>
    %79 = vector.broadcast %7 : vector<1x32xf32> to vector<8x32xf32>
    %80 = arith.mulf %60, %79 : vector<8x32xf32>
    %81 = vector.broadcast %8 : vector<1x32xf32> to vector<8x32xf32>
    %82 = arith.mulf %78, %81 : vector<8x32xf32>
    %83 = arith.addf %80, %82 : vector<8x32xf32>
    %cst_34 = arith.constant dense<0.000000e+00> : vector<8xf32>
    %84 = vector.multi_reduction <add>, %83, %cst_34 [1] : vector<8x32xf32> to vector<8xf32>
    %85 = vector.shape_cast %84 : vector<8xf32> to vector<8x1xf32>
    %86 = vector.broadcast %9 : vector<1x1xf32> to vector<8x1xf32>
    %87 = arith.addf %85, %86 : vector<8x1xf32>
    %88 = vector.extract_strided_slice %74 {offsets = [0, 0], sizes = [1, 8], strides = [1, 1]} : vector<8x8xf32> to vector<1x8xf32>
    %89 = tpu.concatenate %78, %41 in 1 : vector<8x32xf32>, vector<8x32xf32> -> vector<8x64xf32>
    %90 = vector.broadcast %87 : vector<8x1xf32> to vector<8x128xf32>
    %91 = vector.broadcast %2 : vector<1x128xf32> to vector<8x128xf32>
    %92 = arith.mulf %90, %91 : vector<8x128xf32>
    %cst_35 = arith.constant dense<0.000000e+00> : vector<8x128xf32>
    %93 = tpu.matmul %89, %3, %cst_35 {dimension_numbers = #tpu.dot_dimension_numbers<[1], [0], [0], [1], [0, 0, 1, 1], [], []>} : vector<8x64xf32>, vector<64x128xf32>, vector<8x128xf32> -> vector<8x128xf32>
    %94 = arith.addf %92, %93 : vector<8x128xf32>
    %95 = vector.broadcast %4 : vector<1x128xf32> to vector<8x128xf32>
    %96 = arith.addf %94, %95 : vector<8x128xf32>
    %97 = arith.negf %96 : vector<8x128xf32>
    %98 = math.exp %97 : vector<8x128xf32>
    %cst_36 = arith.constant 1.000000e+00 : f32
    %99 = vector.broadcast %cst_36 : f32 to vector<8x128xf32>
    %100 = arith.addf %99, %98 : vector<8x128xf32>
    %101 = arith.divf %99, %100 : vector<8x128xf32>
    %102 = math.tanh %96 : vector<8x128xf32>
    %103 = vector.extract_strided_slice %101 {offsets = [0, 0], sizes = [8, 32], strides = [1, 1]} : vector<8x128xf32> to vector<8x32xf32>
    %104 = vector.extract_strided_slice %101 {offsets = [0, 32], sizes = [8, 32], strides = [1, 1]} : vector<8x128xf32> to vector<8x32xf32>
    %105 = vector.extract_strided_slice %102 {offsets = [0, 64], sizes = [8, 32], strides = [1, 1]} : vector<8x128xf32> to vector<8x32xf32>
    %106 = vector.extract_strided_slice %101 {offsets = [0, 96], sizes = [8, 32], strides = [1, 1]} : vector<8x128xf32> to vector<8x32xf32>
    %107 = arith.mulf %104, %39 : vector<8x32xf32>
    %108 = arith.mulf %103, %105 : vector<8x32xf32>
    %109 = arith.addf %107, %108 : vector<8x32xf32>
    %110 = math.tanh %109 : vector<8x32xf32>
    %111 = arith.mulf %106, %110 : vector<8x32xf32>
    %112 = tpu.concatenate %111, %60 in 1 : vector<8x32xf32>, vector<8x32xf32> -> vector<8x64xf32>
    %cst_37 = arith.constant dense<0.000000e+00> : vector<8x128xf32>
    %113 = tpu.matmul %112, %5, %cst_37 {dimension_numbers = #tpu.dot_dimension_numbers<[1], [0], [0], [1], [0, 0, 1, 1], [], []>} : vector<8x64xf32>, vector<64x128xf32>, vector<8x128xf32> -> vector<8x128xf32>
    %114 = vector.broadcast %6 : vector<1x128xf32> to vector<8x128xf32>
    %115 = arith.addf %113, %114 : vector<8x128xf32>
    %116 = arith.negf %115 : vector<8x128xf32>
    %117 = math.exp %116 : vector<8x128xf32>
    %cst_38 = arith.constant 1.000000e+00 : f32
    %118 = vector.broadcast %cst_38 : f32 to vector<8x128xf32>
    %119 = arith.addf %118, %117 : vector<8x128xf32>
    %120 = arith.divf %118, %119 : vector<8x128xf32>
    %121 = math.tanh %115 : vector<8x128xf32>
    %122 = vector.extract_strided_slice %120 {offsets = [0, 0], sizes = [8, 32], strides = [1, 1]} : vector<8x128xf32> to vector<8x32xf32>
    %123 = vector.extract_strided_slice %120 {offsets = [0, 32], sizes = [8, 32], strides = [1, 1]} : vector<8x128xf32> to vector<8x32xf32>
    %124 = vector.extract_strided_slice %121 {offsets = [0, 64], sizes = [8, 32], strides = [1, 1]} : vector<8x128xf32> to vector<8x32xf32>
    %125 = vector.extract_strided_slice %120 {offsets = [0, 96], sizes = [8, 32], strides = [1, 1]} : vector<8x128xf32> to vector<8x32xf32>
    %126 = arith.mulf %123, %58 : vector<8x32xf32>
    %127 = arith.mulf %122, %124 : vector<8x32xf32>
    %128 = arith.addf %126, %127 : vector<8x32xf32>
    %129 = math.tanh %128 : vector<8x32xf32>
    %130 = arith.mulf %125, %129 : vector<8x32xf32>
    %131 = vector.shape_cast %130 : vector<8x32xf32> to vector<8x1x32xf32>
    %132 = vector.broadcast %131 : vector<8x1x32xf32> to vector<8x8x32xf32>
    %133 = arith.mulf %11, %132 : vector<8x8x32xf32>
    %cst_39 = arith.constant dense<0.000000e+00> : vector<8x8xf32>
    %134 = vector.multi_reduction <add>, %133, %cst_39 [2] : vector<8x8x32xf32> to vector<8x8xf32>
    %cst_40 = arith.constant dense<0xFF800000> : vector<8xf32>
    %135 = vector.multi_reduction <maximumf>, %134, %cst_40 [1] : vector<8x8xf32> to vector<8xf32>
    %136 = vector.shape_cast %135 : vector<8xf32> to vector<8x1xf32>
    %137 = vector.broadcast %136 : vector<8x1xf32> to vector<8x8xf32>
    %138 = arith.subf %134, %137 : vector<8x8xf32>
    %139 = math.exp %138 : vector<8x8xf32>
    %cst_41 = arith.constant dense<0.000000e+00> : vector<8xf32>
    %140 = vector.multi_reduction <add>, %139, %cst_41 [1] : vector<8x8xf32> to vector<8xf32>
    %141 = vector.shape_cast %140 : vector<8xf32> to vector<8x1xf32>
    %142 = tpu.reciprocal %141 : vector<8x1xf32> -> vector<8x1xf32>
    %143 = vector.broadcast %142 : vector<8x1xf32> to vector<8x8xf32>
    %144 = arith.mulf %139, %143 : vector<8x8xf32>
    %145 = vector.shape_cast %144 : vector<8x8xf32> to vector<8x8x1xf32>
    %146 = vector.broadcast %145 : vector<8x8x1xf32> to vector<8x8x32xf32>
    %147 = arith.mulf %146, %1 : vector<8x8x32xf32>
    %cst_42 = arith.constant dense<0.000000e+00> : vector<8x32xf32>
    %148 = vector.multi_reduction <add>, %147, %cst_42 [1] : vector<8x8x32xf32> to vector<8x32xf32>
    %149 = vector.broadcast %7 : vector<1x32xf32> to vector<8x32xf32>
    %150 = arith.mulf %130, %149 : vector<8x32xf32>
    %151 = vector.broadcast %8 : vector<1x32xf32> to vector<8x32xf32>
    %152 = arith.mulf %148, %151 : vector<8x32xf32>
    %153 = arith.addf %150, %152 : vector<8x32xf32>
    %cst_43 = arith.constant dense<0.000000e+00> : vector<8xf32>
    %154 = vector.multi_reduction <add>, %153, %cst_43 [1] : vector<8x32xf32> to vector<8xf32>
    %155 = vector.shape_cast %154 : vector<8xf32> to vector<8x1xf32>
    %156 = vector.broadcast %9 : vector<1x1xf32> to vector<8x1xf32>
    %157 = arith.addf %155, %156 : vector<8x1xf32>
    %158 = vector.extract_strided_slice %144 {offsets = [0, 0], sizes = [1, 8], strides = [1, 1]} : vector<8x8xf32> to vector<1x8xf32>
    %159 = tpu.concatenate %148, %111 in 1 : vector<8x32xf32>, vector<8x32xf32> -> vector<8x64xf32>
    %160 = vector.broadcast %157 : vector<8x1xf32> to vector<8x128xf32>
    %161 = vector.broadcast %2 : vector<1x128xf32> to vector<8x128xf32>
    %162 = arith.mulf %160, %161 : vector<8x128xf32>
    %cst_44 = arith.constant dense<0.000000e+00> : vector<8x128xf32>
    %163 = tpu.matmul %159, %3, %cst_44 {dimension_numbers = #tpu.dot_dimension_numbers<[1], [0], [0], [1], [0, 0, 1, 1], [], []>} : vector<8x64xf32>, vector<64x128xf32>, vector<8x128xf32> -> vector<8x128xf32>
    %164 = arith.addf %162, %163 : vector<8x128xf32>
    %165 = vector.broadcast %4 : vector<1x128xf32> to vector<8x128xf32>
    %166 = arith.addf %164, %165 : vector<8x128xf32>
    %167 = arith.negf %166 : vector<8x128xf32>
    %168 = math.exp %167 : vector<8x128xf32>
    %cst_45 = arith.constant 1.000000e+00 : f32
    %169 = vector.broadcast %cst_45 : f32 to vector<8x128xf32>
    %170 = arith.addf %169, %168 : vector<8x128xf32>
    %171 = arith.divf %169, %170 : vector<8x128xf32>
    %172 = math.tanh %166 : vector<8x128xf32>
    %173 = vector.extract_strided_slice %171 {offsets = [0, 0], sizes = [8, 32], strides = [1, 1]} : vector<8x128xf32> to vector<8x32xf32>
    %174 = vector.extract_strided_slice %171 {offsets = [0, 32], sizes = [8, 32], strides = [1, 1]} : vector<8x128xf32> to vector<8x32xf32>
    %175 = vector.extract_strided_slice %172 {offsets = [0, 64], sizes = [8, 32], strides = [1, 1]} : vector<8x128xf32> to vector<8x32xf32>
    %176 = vector.extract_strided_slice %171 {offsets = [0, 96], sizes = [8, 32], strides = [1, 1]} : vector<8x128xf32> to vector<8x32xf32>
    %177 = arith.mulf %174, %109 : vector<8x32xf32>
    %178 = arith.mulf %173, %175 : vector<8x32xf32>
    %179 = arith.addf %177, %178 : vector<8x32xf32>
    %180 = math.tanh %179 : vector<8x32xf32>
    %181 = arith.mulf %176, %180 : vector<8x32xf32>
    %182 = tpu.concatenate %181, %130 in 1 : vector<8x32xf32>, vector<8x32xf32> -> vector<8x64xf32>
    %cst_46 = arith.constant dense<0.000000e+00> : vector<8x128xf32>
    %183 = tpu.matmul %182, %5, %cst_46 {dimension_numbers = #tpu.dot_dimension_numbers<[1], [0], [0], [1], [0, 0, 1, 1], [], []>} : vector<8x64xf32>, vector<64x128xf32>, vector<8x128xf32> -> vector<8x128xf32>
    %184 = vector.broadcast %6 : vector<1x128xf32> to vector<8x128xf32>
    %185 = arith.addf %183, %184 : vector<8x128xf32>
    %186 = arith.negf %185 : vector<8x128xf32>
    %187 = math.exp %186 : vector<8x128xf32>
    %cst_47 = arith.constant 1.000000e+00 : f32
    %188 = vector.broadcast %cst_47 : f32 to vector<8x128xf32>
    %189 = arith.addf %188, %187 : vector<8x128xf32>
    %190 = arith.divf %188, %189 : vector<8x128xf32>
    %191 = math.tanh %185 : vector<8x128xf32>
    %192 = vector.extract_strided_slice %190 {offsets = [0, 0], sizes = [8, 32], strides = [1, 1]} : vector<8x128xf32> to vector<8x32xf32>
    %193 = vector.extract_strided_slice %190 {offsets = [0, 32], sizes = [8, 32], strides = [1, 1]} : vector<8x128xf32> to vector<8x32xf32>
    %194 = vector.extract_strided_slice %191 {offsets = [0, 64], sizes = [8, 32], strides = [1, 1]} : vector<8x128xf32> to vector<8x32xf32>
    %195 = vector.extract_strided_slice %190 {offsets = [0, 96], sizes = [8, 32], strides = [1, 1]} : vector<8x128xf32> to vector<8x32xf32>
    %196 = arith.mulf %193, %128 : vector<8x32xf32>
    %197 = arith.mulf %192, %194 : vector<8x32xf32>
    %198 = arith.addf %196, %197 : vector<8x32xf32>
    %199 = math.tanh %198 : vector<8x32xf32>
    %200 = arith.mulf %195, %199 : vector<8x32xf32>
    %201 = vector.shape_cast %200 : vector<8x32xf32> to vector<8x1x32xf32>
    %202 = vector.broadcast %201 : vector<8x1x32xf32> to vector<8x8x32xf32>
    %203 = arith.mulf %11, %202 : vector<8x8x32xf32>
    %cst_48 = arith.constant dense<0.000000e+00> : vector<8x8xf32>
    %204 = vector.multi_reduction <add>, %203, %cst_48 [2] : vector<8x8x32xf32> to vector<8x8xf32>
    %cst_49 = arith.constant dense<0xFF800000> : vector<8xf32>
    %205 = vector.multi_reduction <maximumf>, %204, %cst_49 [1] : vector<8x8xf32> to vector<8xf32>
    %206 = vector.shape_cast %205 : vector<8xf32> to vector<8x1xf32>
    %207 = vector.broadcast %206 : vector<8x1xf32> to vector<8x8xf32>
    %208 = arith.subf %204, %207 : vector<8x8xf32>
    %209 = math.exp %208 : vector<8x8xf32>
    %cst_50 = arith.constant dense<0.000000e+00> : vector<8xf32>
    %210 = vector.multi_reduction <add>, %209, %cst_50 [1] : vector<8x8xf32> to vector<8xf32>
    %211 = vector.shape_cast %210 : vector<8xf32> to vector<8x1xf32>
    %212 = tpu.reciprocal %211 : vector<8x1xf32> -> vector<8x1xf32>
    %213 = vector.broadcast %212 : vector<8x1xf32> to vector<8x8xf32>
    %214 = arith.mulf %209, %213 : vector<8x8xf32>
    %215 = vector.shape_cast %214 : vector<8x8xf32> to vector<8x8x1xf32>
    %216 = vector.broadcast %215 : vector<8x8x1xf32> to vector<8x8x32xf32>
    %217 = arith.mulf %216, %1 : vector<8x8x32xf32>
    %cst_51 = arith.constant dense<0.000000e+00> : vector<8x32xf32>
    %218 = vector.multi_reduction <add>, %217, %cst_51 [1] : vector<8x8x32xf32> to vector<8x32xf32>
    %219 = vector.broadcast %7 : vector<1x32xf32> to vector<8x32xf32>
    %220 = arith.mulf %200, %219 : vector<8x32xf32>
    %221 = vector.broadcast %8 : vector<1x32xf32> to vector<8x32xf32>
    %222 = arith.mulf %218, %221 : vector<8x32xf32>
    %223 = arith.addf %220, %222 : vector<8x32xf32>
    %cst_52 = arith.constant dense<0.000000e+00> : vector<8xf32>
    %224 = vector.multi_reduction <add>, %223, %cst_52 [1] : vector<8x32xf32> to vector<8xf32>
    %225 = vector.shape_cast %224 : vector<8xf32> to vector<8x1xf32>
    %226 = vector.broadcast %9 : vector<1x1xf32> to vector<8x1xf32>
    %227 = arith.addf %225, %226 : vector<8x1xf32>
    %228 = vector.extract_strided_slice %214 {offsets = [0, 0], sizes = [1, 8], strides = [1, 1]} : vector<8x8xf32> to vector<1x8xf32>
    %229 = tpu.concatenate %87, %157, %227 in 1 : vector<8x1xf32>, vector<8x1xf32>, vector<8x1xf32> -> vector<8x3xf32>
    %c0_53 = arith.constant 0 : index
    %c0_54 = arith.constant 0 : index
    %230 = vector.load %arg11[%c0_53, %c0_54] : memref<8x3xf32, #tpu.memory_space<vmem>>, vector<8x3xf32>
    tpu.vector_store %arg11[%c0_53, %c0_54], %229 {strides = array<i32>} : memref<8x3xf32, #tpu.memory_space<vmem>>, vector<8x3xf32>,
    %231 = tpu.concatenate %88, %158, %228 in 0 : vector<1x8xf32>, vector<1x8xf32>, vector<1x8xf32> -> vector<3x8xf32>
    %232 = vector.shape_cast %231 : vector<3x8xf32> to vector<1x3x8xf32>
    %c0_55 = arith.constant 0 : index
    %c0_56 = arith.constant 0 : index
    %c0_57 = arith.constant 0 : index
    %233 = vector.load %arg12[%c0_55, %c0_56, %c0_57] : memref<1x3x8xf32, #tpu.memory_space<vmem>>, vector<1x3x8xf32>
    tpu.vector_store %arg12[%c0_55, %c0_56, %c0_57], %232 {strides = array<i32>} : memref<1x3x8xf32, #tpu.memory_space<vmem>>, vector<1x3x8xf32>,
    return
  }
  func.func @transform_0(%arg0: i32) -> (i32, i32, i32) {
    %c0_i32 = arith.constant 0 : i32
    %c0_i32_0 = arith.constant 0 : i32
    %c0_i32_1 = arith.constant 0 : i32
    return %arg0, %c0_i32, %c0_i32_0 : i32, i32, i32
  }
  func.func @transform_1(%arg0: i32) -> (i32, i32, i32) {
    %c0_i32 = arith.constant 0 : i32
    %c0_i32_0 = arith.constant 0 : i32
    %c0_i32_1 = arith.constant 0 : i32
    return %arg0, %c0_i32, %c0_i32_0 : i32, i32, i32
  }
  func.func @transform_2(%arg0: i32) -> (i32, i32) {
    %c0_i32 = arith.constant 0 : i32
    %c0_i32_0 = arith.constant 0 : i32
    %c0_i32_1 = arith.constant 0 : i32
    return %c0_i32, %c0_i32_0 : i32, i32
  }
  func.func @transform_3(%arg0: i32) -> (i32, i32) {
    %c0_i32 = arith.constant 0 : i32
    %c0_i32_0 = arith.constant 0 : i32
    %c0_i32_1 = arith.constant 0 : i32
    return %c0_i32, %c0_i32_0 : i32, i32
  }
  func.func @transform_4(%arg0: i32) -> (i32, i32) {
    %c0_i32 = arith.constant 0 : i32
    %c0_i32_0 = arith.constant 0 : i32
    %c0_i32_1 = arith.constant 0 : i32
    return %c0_i32, %c0_i32_0 : i32, i32
  }
  func.func @transform_5(%arg0: i32) -> (i32, i32) {
    %c0_i32 = arith.constant 0 : i32
    %c0_i32_0 = arith.constant 0 : i32
    %c0_i32_1 = arith.constant 0 : i32
    return %c0_i32, %c0_i32_0 : i32, i32
  }
  func.func @transform_6(%arg0: i32) -> (i32, i32) {
    %c0_i32 = arith.constant 0 : i32
    %c0_i32_0 = arith.constant 0 : i32
    %c0_i32_1 = arith.constant 0 : i32
    return %c0_i32, %c0_i32_0 : i32, i32
  }
  func.func @transform_7(%arg0: i32) -> (i32, i32) {
    %c0_i32 = arith.constant 0 : i32
    %c0_i32_0 = arith.constant 0 : i32
    %c0_i32_1 = arith.constant 0 : i32
    return %c0_i32, %c0_i32_0 : i32, i32
  }
  func.func @transform_8(%arg0: i32) -> (i32, i32) {
    %c0_i32 = arith.constant 0 : i32
    %c0_i32_0 = arith.constant 0 : i32
    %c0_i32_1 = arith.constant 0 : i32
    return %c0_i32, %c0_i32_0 : i32, i32
  }
  func.func @transform_9(%arg0: i32) -> (i32, i32) {
    %c0_i32 = arith.constant 0 : i32
    %c0_i32_0 = arith.constant 0 : i32
    %c0_i32_1 = arith.constant 0 : i32
    return %c0_i32, %c0_i32_0 : i32, i32
  }
  func.func @transform_10(%arg0: i32) -> (i32, i32) {
    %c0_i32 = arith.constant 0 : i32
    %c0_i32_0 = arith.constant 0 : i32
    return %arg0, %c0_i32 : i32, i32
  }
  func.func @transform_11(%arg0: i32) -> (i32, i32, i32) {
    %c0_i32 = arith.constant 0 : i32
    %c0_i32_0 = arith.constant 0 : i32
    %c0_i32_1 = arith.constant 0 : i32
    return %arg0, %c0_i32, %c0_i32_0 : i32, i32, i32
  }
}

</mosaic_0001>

<bundles_post_ra>
// kernel: tpu_custom_call.1
= control target key start
LH: loop header
LB: loop body
LE: loop exit
PB: predicated region body
PF: predicated region fallthrough
CT: control target
= control target key end

     0   :  { %s3833_s0 = inlined_call_operand.hbm [shape: f32[8,8,32], index: 0, kind: input, shape index: {}]   ;;  %s3834_s1 = inlined_call_operand.hbm [shape: f32[8,8,32], index: 1, kind: input, shape index: {}]   ;;  %s3835_s2 = inlined_call_operand.vmem [shape: f32[1,128], index: 2, kind: input, shape index: {}]   ;;  %s3836_s3 = inlined_call_operand.hbm [shape: f32[64,128], index: 3, kind: input, shape index: {}]   ;;  %s3837_s4 = inlined_call_operand.vmem [shape: f32[1,128], index: 4, kind: input, shape index: {}]   ;;  %s3838_s5 = inlined_call_operand.hbm [shape: f32[64,128], index: 5, kind: input, shape index: {}]   ;;  %s3839_s6 = inlined_call_operand.vmem [shape: f32[1,128], index: 6, kind: input, shape index: {}]   ;;  %s3840_s7 = inlined_call_operand.vmem [shape: f32[1,32], index: 7, kind: input, shape index: {}]   ;;  %s3841_s8 = inlined_call_operand.vmem [shape: f32[1,32], index: 8, kind: input, shape index: {}]   ;;  %s3842_s9 = inlined_call_operand.<no memory space> [shape: f32[1,1], index: 9, kind: input, shape index: {}]   ;;  %s3843_s10 = inlined_call_operand.vmem [shape: f32[8,3], index: 10, kind: output, shape index: {0}]   ;;  %s3844_s11 = inlined_call_operand.vmem [shape: f32[1,3,8], index: 11, kind: output, shape index: {1}]  }
   0x1   :  { %v17_v0 = vstv %s3842_s9 }
   0x2   :  { %18 = vst [vmem:[#allocation2] sm:$0x1] %v17_v0 }
   0x3   :  { %19 = vsyncpa [#allocation4], 0 }
   0x4   :  { %20 = vsyncpa [#allocation6], 0 }
   0x5   :  { %21 = vsyncpa [#allocation9], 0  ;;  %s2984_s19 = smov [#allocation5]   ;;  %s2985_s21 = smov [#allocation3]  }
   0x6   :  { %s39_s20 = sshll.u32 %s2984_s19, 4  ;;  %s27_s22 = sshll.u32 %s2985_s21, 4  ;;  %s40_s20 = int_to_ptr.vmem [resolvable:$true] %s39_s20  ;;  %s3063_s22 = int_to_ptr.vmem [resolvable:$true] %s27_s22 }
   0x7   :  { %s2890_s25 = scalar_lea.hbm %s3834_s1, 1024 }
   0x8   :  { %p2891_p0 = scmp.ne.s32.totalorder %s3834_s1, %s2890_s25  ;;  %p2894_p1 = scmp.lt.u32.totalorder %s2890_s25, %s3834_s1 }
   0xa   :  { %p2896_p2 = pnand %p2894_p1, %p2891_p0 }
   0xc   :  { %2899 = shalt.err (!%p2896_p2)
}
   0xd   :  { %s2900_s29 = scalar_lea.vmem %s40_s20, 1024  ;;  %p2905_p4 = scmp.lt.s32.totalorder %s40_s20, %s40_s20 }
   0xe   :  { %p2901_p3 = scmp.ne.s32.totalorder %s40_s20, %s2900_s29  ;;  %p2906_p5 = scmp.lt.s32.totalorder %s2900_s29, %s2900_s29 }
  0x10   :  { %p2907_p6 = por %p2906_p5, %p2905_p4 }
  0x12   :  { %p2908_p7 = pnand %p2907_p6, %p2901_p3 }
  0x14   :  { %2911 = shalt.err (!%p2908_p7)
}
  0x15   :  { %s2986_s30 = smov 128   ;;  %s2987_s12 = smov 8  }
  0x16   :  { %45 = dma.hbm_to_vmem [thread:$0]  %s3834_s1, 1024, %s40_s20, [#allocation6], %s2986_s30, %s2986_s30, %s2987_s12  }
  0x17   :  { %s2912_s17 = scalar_lea.hbm %s3833_s0, 1024 }
  0x18   :  { %p2913_p8 = scmp.ne.s32.totalorder %s3833_s0, %s2912_s17  ;;  %p2916_p9 = scmp.lt.u32.totalorder %s2912_s17, %s3833_s0 }
  0x1a   :  { %p2918_p10 = pnand %p2916_p9, %p2913_p8 }
  0x1c   :  { %2921 = shalt.err (!%p2918_p10)
}
  0x1d   :  { %s2922_s24 = scalar_lea.vmem %s3063_s22, 1024  ;;  %p2927_p12 = scmp.lt.s32.totalorder %s3063_s22, %s3063_s22 }
  0x1e   :  { %p2923_p11 = scmp.ne.s32.totalorder %s3063_s22, %s2922_s24  ;;  %p2928_p13 = scmp.lt.s32.totalorder %s2922_s24, %s2922_s24 }
  0x20   :  { %p2929_p0 = por %p2928_p13, %p2927_p12 }
  0x22   :  { %p2930_p1 = pnand %p2929_p0, %p2923_p11 }
  0x24   :  { %2933 = shalt.err (!%p2930_p1)
}
  0x25   :  { %33 = dma.hbm_to_vmem [thread:$0]  %s3833_s0, 1024, %s3063_s22, [#allocation4], %s2986_s30, %s2986_s30, %s2987_s12  }
  0x26   :  { %s2988_s25 = smov [#allocation7]   ;;  %s2989_s27 = smov [#allocation8]  }
  0x27   :  { %s53_s26 = sshll.u32 %s2988_s25, 4  ;;  %s67_s9 = sshll.u32 %s2989_s27, 4  ;;  %s54_s26 = int_to_ptr.vmem [resolvable:$true] %s53_s26  ;;  %s3100_s9 = int_to_ptr.vmem [resolvable:$true] %s67_s9 }
  0x28   :  { %s2934_s13 = scalar_lea.hbm %s3836_s3, 1024 }
  0x29   :  { %p2935_p2 = scmp.ne.s32.totalorder %s3836_s3, %s2934_s13  ;;  %p2938_p3 = scmp.lt.u32.totalorder %s2934_s13, %s3836_s3 }
  0x2b   :  { %p2940_p4 = pnand %p2938_p3, %p2935_p2 }
  0x2d   :  { %2943 = shalt.err (!%p2940_p4)
}
  0x2e   :  { %s2944_s0 = scalar_lea.vmem %s54_s26, 1024  ;;  %p2949_p6 = scmp.lt.s32.totalorder %s54_s26, %s54_s26 }
  0x2f   :  { %p2945_p5 = scmp.ne.s32.totalorder %s54_s26, %s2944_s0  ;;  %p2950_p7 = scmp.lt.s32.totalorder %s2944_s0, %s2944_s0 }
  0x31   :  { %p2951_p8 = por %p2950_p7, %p2949_p6 }
  0x33   :  { %p2952_p9 = pnand %p2951_p8, %p2945_p5 }
  0x35   :  { %2955 = shalt.err (!%p2952_p9)
}
  0x36   :  { %59 = dma.hbm_to_vmem [thread:$0]  %s3836_s3, 1024, %s54_s26, [#allocation6], %s2986_s30, %s2986_s30, %s2987_s12  }
  0x37   :  { %s2956_s23 = scalar_lea.hbm %s3838_s5, 1024 }
  0x38   :  { %p2957_p10 = scmp.ne.s32.totalorder %s3838_s5, %s2956_s23  ;;  %p2960_p11 = scmp.lt.u32.totalorder %s2956_s23, %s3838_s5 }
  0x3a   :  { %p2962_p12 = pnand %p2960_p11, %p2957_p10 }
  0x3c   :  { %2965 = shalt.err (!%p2962_p12)
}
  0x3d   :  { %s2966_s27 = scalar_lea.vmem %s3100_s9, 1024  ;;  %p2971_p0 = scmp.lt.s32.totalorder %s3100_s9, %s3100_s9 }
  0x3e   :  { %p2967_p13 = scmp.ne.s32.totalorder %s3100_s9, %s2966_s27  ;;  %p2972_p1 = scmp.lt.s32.totalorder %s2966_s27, %s2966_s27 }
  0x40   :  { %p2973_p2 = por %p2972_p1, %p2971_p0 }
  0x42   :  { %p2974_p3 = pnand %p2973_p2, %p2967_p13 }
  0x44   :  { %2977 = shalt.err (!%p2974_p3)
}
  0x45   :  { %73 = dma.hbm_to_vmem [thread:$0]  %s3838_s5, 1024, %s3100_s9, [#allocation9], %s2986_s30, %s2986_s30, %s2987_s12  }
  0x46   :  { %2978 = dma.done.wait [#allocation4], 1024  }
  0x47   :  { %2979 = vsyncadd [#allocation4], 4294966272 }
  0x48   :  { %2980 = dma.done.wait [#allocation6], 2048  }
  0x49   :  { %2981 = vsyncadd [#allocation6], 4294965248 }
  0x4a   :  { %2982 = dma.done.wait [#allocation9], 1024  }
  0x4b   :  { %2983 = vsyncadd [#allocation9], 4294966272  ;;  %v3845_v1 = vmov 0.0|0.0   ;;  %vm2991_vm0 = vmmov 0   ;;  %v3847_v2 = vmov 0.0   ;;  %v111_v3 = vld [vmem:[#allocation7] sm:$0xff] }
  0x4c   :  { %2685 = vmatprep.subr.bf16.mxu0 %v3845_v1  ;;  %2587 = vmatprep.mubr.msk.f32.mxu0 %vm2991_vm0, %v3847_v2  ;;  %v112_v4 = vld [vmem:[#allocation7 + $0x8] sm:$0xff]  ;;  %v113_v5 = vld [vmem:[#allocation7 + $0x10] sm:$0xff]  ;;  %v114_v7 = vld [vmem:[#allocation7 + $0x18] sm:$0xff]  ;;  %vm149_vm1 = vcmask 1041409   ;;  %vm152_vm2 = vcmask 1042434   ;;  %vm155_vm3 = vcmask 1043459  }
  0x4d   :  { %2697 = vmatprep.subr.bf16.mxu1 %v3845_v1  ;;  %2606 = vmatprep.mubr.msk.f32.mxu1 %vm2991_vm0, %v3847_v2  ;;  %v3143_v6 = vpack.c.bf16 %v112_v4, %v111_v3  ;;  %v115_v8 = vld [vmem:[#allocation7 + $0x20] sm:$0xff]  ;;  %v116_v9 = vld [vmem:[#allocation7 + $0x28] sm:$0xff]  ;;  %v3148_v11 = vpack.c.bf16 %v114_v7, %v113_v5  ;;  %v3152_v13 = vld [vmem:[#allocation5 + $0x10] sm:$0xff]  ;;  %vm158_vm4 = vcmask 1044484   ;;  %vm161_vm5 = vcmask 1045509   ;;  %s2993_s28 = smov 64  }
  0x4e   :  { %v3145_v10 = vld [vmem:[#allocation5] sm:$0xff]  ;;  %v3150_v12 = vld [vmem:[#allocation5 + $0x8] sm:$0xff]  ;;  %v3154_v14 = vld [vmem:[#allocation5 + $0x18] sm:$0xff]  ;;  %v151_v19 = vrot.slane %v3152_v13, 6  ;;  %v3173_v25 = vpack.c.bf16 %v116_v9, %v115_v8  ;;  %vm164_vm6 = vcmask 1046534   ;;  %vm167_vm7 = vcmask 1047559  }
  0x4f   :  { %2687 = vmatpush3.bf16.msra.mxu0 %v3143_v6  ;;  %v3157_v15 = vld [vmem:[#allocation5 + $0x20] sm:$0xff]  ;;  %v3159_v16 = vld [vmem:[#allocation5 + $0x28] sm:$0xff]  ;;  %v3161_v17 = vld [vmem:[#allocation5 + $0x30] sm:$0xff]  ;;  %v148_v18 = vrot.slane %v3150_v12, 7  ;;  %v154_v20 = vrot.slane %v3154_v14, 5  ;;  %vm170_vm8 = vcmask 261120  }
  0x50   :  { %2688 = vmatprep.subr.bf16.mxu0 %v3845_v1  ;;  %v3166_v21 = vld [vmem:[#allocation5 + $0x38] sm:$0xff]  ;;  %v157_v22 = vrot.slane %v3157_v15, 4  ;;  %v160_v24 = vrot.slane %v3159_v16, 3  ;;  %v163_v27 = vrot.slane %v3161_v17, 2  ;;  %v117_v28 = vld [vmem:[#allocation7 + $0x30] sm:$0xff]  ;;  %vm179_vm9 = vcmask 523264  }
  0x51   :  { %v150_v23 = vsel %vm149_vm1, %v148_v18, %v3145_v10  ;;  %v118_v29 = vld [vmem:[#allocation7 + $0x38] sm:$0xff]  ;;  %v166_v31 = vrot.slane %v3166_v21, 1  ;;  %s2994_s29 = smov 32   ;;  %v120_v55 = vld [vmem:[#allocation8] sm:$0xff]  ;;  %v121_v56 = vld [vmem:[#allocation8 + $0x8] sm:$0xff]  ;;  %vm581_vm10 = vcmask 64512  }
  0x52   :  { %v153_v26 = vsel %vm152_vm2, %v151_v19, %v150_v23  ;;  %v3183_v34 = vpack.c.bf16 %v118_v29, %v117_v28  ;;  %v3205_v38 = vld [vmem:[%s3835_s2] ss:$0 sm:$0xff]  ;;  %v122_v57 = vld [vmem:[#allocation8 + $0x10] sm:$0xff]  ;;  %v3219_v58 = vpack.c.bf16 %v121_v56, %v120_v55  ;;  %v124_v61 = vld [vmem:[#allocation8 + $0x20] sm:$0xff]  ;;  %s2997_s17 = smov 96   ;;  %vm2482_vm11 = vcmask 1040384  }
  0x53   :  { %2690 = vmatpush3.bf16.msra.mxu0 %v3148_v11  ;;  %v156_v30 = vsel %vm155_vm3, %v154_v20, %v153_v26  ;;  %v178_v39 = vmul.f32 0.0, %v3205_v38  ;;  %v3211_v40 = vld [vmem:[%s3837_s4] ss:$0 sm:$0xff]  ;;  %v125_v62 = vld [vmem:[#allocation8 + $0x28] sm:$0xff]  ;;  %v126_v0 = vld [vmem:[#allocation8 + $0x30] sm:$0xff]  ;;  %vm2484_vm12 = vcmask 1041408  }
  0x54   :  { %2691 = vmatprep.subr.bf16.mxu0 %v3845_v1  ;;  %v159_v32 = vsel %vm158_vm4, %v157_v22, %v156_v30  ;;  %v123_v59 = vld [vmem:[#allocation8 + $0x18] sm:$0xff]  ;;  %2699 = vmatpush3.bf16.msra.mxu1 %v3219_v58  ;;  %v3226_v63 = vpack.c.bf16 %v125_v62, %v124_v61  ;;  %vm2486_vm13 = vcmask 59392   ;;  %s2999_s1 = smov 2   ;;  %vm2461_vm14 = vcmask 7168  }
  0x55   :  { %v162_v33 = vsel %vm161_vm5, %v160_v24, %v159_v32  ;;  %v3222_v60 = vpack.c.bf16 %v123_v59, %v122_v57  ;;  %2700 = vmatprep.subr.bf16.mxu1 %v3845_v1  ;;  %v127_v3 = vld [vmem:[#allocation8 + $0x38] sm:$0xff]  ;;  %vm2463_vm15 = vcmask 15360  }
  0x56   :  { %v165_v35 = vsel %vm164_vm6, %v163_v27, %v162_v33  ;;  %v3231_v5 = vpack.c.bf16 %v127_v3, %v126_v0  ;;  %v3255_v19 = vld [vmem:[%s3839_s6] ss:$0 sm:$0xff] }
  0x57   :  { %2693 = vmatpush3.bf16.msra.mxu0 %v3173_v25  ;;  %v168_v36 = vsel %vm167_vm7, %v166_v31, %v165_v35 }
  0x58   :  { %2694 = vmatprep.subr.bf16.mxu0 %v3845_v1  ;;  %v171_v37 = vsel %vm170_vm8, %v168_v36, 0.0  ;;  %2702 = vmatpush3.bf16.msra.mxu1 %v3222_v60 }
  0x59   :  { %2703 = vmatprep.subr.bf16.mxu1 %v3845_v1 }
  0x5b   :  { %2696 = vmatpush3.bf16.msra.mxu0 %v3183_v34 }
  0x5c   :  { %2709 = vmatprep.subr.bf16.mxu0 %v3845_v1  ;;  %2705 = vmatpush3.bf16.msra.mxu1 %v3226_v63 }
  0x5d   :  { %2706 = vmatprep.subr.bf16.mxu1 %v3845_v1 }
  0x5e   :  { %2588 = vmatmul.mubr.msk.f32.vlgmr.msra.gmra.mrb[0].mxu0 %vm179_vm9, %v171_v37  ;;  %v2995_v37 = vmov 1966171168  }
  0x5f   :  { %2711 = vmatpush3.bf16.msra.mxu0 %v3143_v6  ;;  %2625 = vmatprep.mubr.msk.f32.mxu0 %vm2991_vm0, %v3847_v2 }
  0x60   :  { %2712 = vmatprep.subr.bf16.mxu0 %v3845_v1  ;;  %2708 = vmatpush3.bf16.msra.mxu1 %v3231_v5 }
  0x61   :  { %2721 = vmatprep.subr.bf16.mxu1 %v3845_v1 }
  0x63   :  { %2714 = vmatpush3.bf16.msra.mxu0 %v3148_v11 }
  0x64   :  { %2715 = vmatprep.subr.bf16.mxu0 %v3845_v1 }
  0x67   :  { %2717 = vmatpush3.bf16.msra.mxu0 %v3173_v25 }
  0x68   :  { %2718 = vmatprep.subr.bf16.mxu0 %v3845_v1 }
  0x6b   :  { %2720 = vmatpush3.bf16.msra.mxu0 %v3183_v34 }
  0x6c   :  { %2733 = vmatprep.subr.bf16.mxu0 %v3845_v1 }
 0x131   :  { %v249_v41 = vpop.f32.mrb[0].mxu0 }
 0x132   :  { %v253_v42 = vadd.f32 %v249_v41, %v178_v39  ;;  %v2589_v43 = vpop.f32.mrb[1].mxu0  ;;  %v396_v39 = vunpack.c.l.s4 %v2995_v37  ;;  %v398_v41 = vlaneseq  ;;  %v98_v37 = vld [vmem:[#allocation3 + $0x20] sm:$0xff] }
 0x134   :  { %v260_v44 = vadd.f32 %v3211_v40, %v253_v42  ;;  %v397_v42 = vunpack.c.0.s8 %v396_v39  ;;  %v3265_v43 = vshrl.u32 %v398_v41, 7 }
 0x136   :  { %2775 = vtanh.f32 %v260_v44  ;;  %v2502_v46 = vmul.f32 -1.442695, %v260_v44  ;;  %v3268_v44 = vsub.s32 %v397_v42, %v3265_v43 }
 0x138   :  { %2777 = vpow2.f32 %v2502_v46 }
 0x140   :  { %v2776_v45 = vpop.eup %2775 }
 0x141   :  { %270 = vrot.lane.b32.xlu0 %v2776_v45, %s2993_s28 }
 0x142   :  { %v2778_v47 = vpop.eup %2777 }
 0x143   :  { %v264_v48 = vadd.f32 1.0, %v2778_v47 }
 0x145   :  { %2779 = vrcp.f32 %v264_v48 }
 0x14f   :  { %v2780_v49 = vpop.eup %2779 }
 0x150   :  { %v268_v52 = vmul.f32 0.0, %v2780_v49 }
 0x1b3   :  { %v271_v50 = vpop.permute.xlu0 %270 }
 0x1b4   :  { %v273_v51 = vmul.f32 %v2780_v49, %v271_v50 }
 0x1b6   :  { %275 = vrot.lane.b32.xlu0 %v273_v51, %s2994_s29 }
 0x228   :  { %v276_v53 = vpop.permute.xlu0 %275 }
 0x229   :  { %v3216_v54 = vadd.f32 %v276_v53, %v268_v52 }
 0x22b   :  { %2781 = vtanh.f32 %v3216_v54 }
 0x235   :  { %v2782_v4 = vpop.eup %2781 }
 0x236   :  { %281 = vrot.lane.b32.xlu1 %v2782_v4, %s2993_s28 }
 0x2a8   :  { %v282_v7 = vpop.permute.xlu1 %281 }
 0x2a9   :  { %v3236_v8 = vmul.f32 %v2780_v49, %v282_v7  ;;  %v3277_v49 = vsub.s32 0, %v3265_v43 }
 0x2ab   :  { %286 = vrot.lane.b32.xlu1 %v3236_v8, %s2994_s29 }
 0x31d   :  { %v287_v9 = vpop.permute.xlu1 %286 }
 0x31e   :  { %v289_v18 = vsel %vm170_vm8, %v287_v9, 0.0 }
 0x31f   :  { %2607 = vmatmul.mubr.msk.f32.vlgmr.msra.gmra.mrb[0].mxu1 %vm179_vm9, %v289_v18 }
 0x320   :  { %2723 = vmatpush3.bf16.msra.mxu1 %v3219_v58  ;;  %2644 = vmatprep.mubr.msk.f32.mxu1 %vm2991_vm0, %v3847_v2 }
 0x321   :  { %2724 = vmatprep.subr.bf16.mxu1 %v3845_v1 }
 0x324   :  { %2726 = vmatpush3.bf16.msra.mxu1 %v3222_v60 }
 0x325   :  { %2727 = vmatprep.subr.bf16.mxu1 %v3845_v1 }
 0x328   :  { %2729 = vmatpush3.bf16.msra.mxu1 %v3226_v63 }
 0x329   :  { %2730 = vmatprep.subr.bf16.mxu1 %v3845_v1 }
 0x32c   :  { %2732 = vmatpush3.bf16.msra.mxu1 %v3231_v5 }
 0x32d   :  { %2745 = vmatprep.subr.bf16.mxu1 %v3845_v1 }
 0x3f2   :  { %v365_v20 = vpop.f32.mrb[0].mxu1 }
 0x3f3   :  { %v366_v22 = vadd.f32 %v3255_v19, %v365_v20  ;;  %v2608_v23 = vpop.f32.mrb[1].mxu1 }
 0x3f5   :  { %2783 = vtanh.f32 %v366_v22  ;;  %v2505_v26 = vmul.f32 -1.442695, %v366_v22 }
 0x3f7   :  { %2785 = vpow2.f32 %v2505_v26  ;;  %v95_v26 = vld [vmem:[#allocation3 + $0x8] sm:$0xff] }
 0x3ff   :  { %v2784_v24 = vpop.eup %2783 }
 0x400   :  { %378 = vrot.lane.b32.xlu0 %v2784_v24, %s2993_s28  ;;  %v94_v24 = vld [vmem:[#allocation3] sm:$0xff] }
 0x401   :  { %v2786_v27 = vpop.eup %2785 }
 0x402   :  { %v372_v28 = vadd.f32 1.0, %v2786_v27  ;;  %v3300_v27 = vmul.f32 0.17677669, %v94_v24 }
 0x404   :  { %2787 = vrcp.f32 %v372_v28  ;;  %v96_v28 = vld [vmem:[#allocation3 + $0x10] sm:$0xff] }
 0x40e   :  { %v2788_v29 = vpop.eup %2787 }
 0x40f   :  { %v376_v32 = vmul.f32 0.0, %v2788_v29 }
 0x472   :  { %v379_v30 = vpop.permute.xlu0 %378 }
 0x473   :  { %v381_v31 = vmul.f32 %v2788_v29, %v379_v30 }
 0x475   :  { %383 = vrot.lane.b32.xlu1 %v381_v31, %s2994_s29  ;;  %v97_v31 = vld [vmem:[#allocation3 + $0x18] sm:$0xff] }
 0x4e7   :  { %v384_v33 = vpop.permute.xlu1 %383 }
 0x4e8   :  { %v3260_v35 = vadd.f32 %v384_v33, %v376_v32  ;;  %v3305_v33 = vmul.f32 0.17677669, %v96_v28 }
 0x4ea   :  { %2789 = vtanh.f32 %v3260_v35 }
 0x4f4   :  { %v2790_v36 = vpop.eup %2789 }
 0x4f5   :  { %389 = vrot.lane.b32.xlu0 %v2790_v36, %s2993_s28 }
 0x567   :  { %v390_v45 = vpop.permute.xlu0 %389 }
 0x568   :  { %v3270_v46 = vmul.f32 %v2788_v29, %v390_v45  ;;  %v3302_v29 = vmul.f32 0.17677669, %v95_v26  ;;  %v3309_v45 = vmul.f32 0.17677669, %v97_v31 }
 0x56a   :  { %v394_v47 = vcombine.high %v3270_v46, %v3270_v46  ;;  %v401_v48 = vrot.slane %v3270_v46, %v3268_v44 }
 0x56c   :  { %v417_v50 = vrot.slane %v401_v48, %v3268_v44  ;;  %v409_v51 = vcombine.high %v401_v48, %v401_v48  ;;  %v408_v52 = vrot.slane %v394_v47, %v3268_v44  ;;  %v99_v48 = vld [vmem:[#allocation3 + $0x28] sm:$0xff] }
 0x56e   :  { %v446_v53 = vrot.slane %v417_v50, %v3277_v49  ;;  %v431_v55 = vrot.slane %v409_v51, %v3268_v44  ;;  %v439_v56 = vcombine.high %v417_v50, %v417_v50  ;;  %v410_v61 = vcombine.high %v408_v52, %v408_v52 }
 0x56f   :  { %v424_v0 = vrot.slane %v408_v52, %v3268_v44  ;;  %v3313_v52 = vmul.f32 0.17677669, %v98_v37 }
 0x570   :  { %475 = vrot.lane.b32.xlu1 %v446_v53, %s2994_s29  ;;  %v450_v57 = vrot.slane %v431_v55, %v3277_v49  ;;  %v441_v59 = vcombine.high %v431_v55, %v431_v55  ;;  %v454_v62 = vrot.slane %v439_v56, %v3277_v49  ;;  %v438_v4 = vrot.slane %v410_v61, %v3268_v44  ;;  %v100_v55 = vld [vmem:[#allocation3 + $0x30] sm:$0xff]  ;;  %v101_v61 = vld [vmem:[#allocation3 + $0x38] sm:$0xff] }
 0x571   :  { %v462_v7 = vrot.slane %v424_v0, %v3277_v49  ;;  %v440_v9 = vcombine.high %v424_v0, %v424_v0 }
 0x572   :  { %477 = vrot.lane.b32.xlu0 %v450_v57, %s2994_s29  ;;  %v458_v3 = vrot.slane %v441_v59, %v3277_v49  ;;  %v466_v18 = vrot.slane %v438_v4, %v3277_v49  ;;  %v442_v20 = vcombine.high %v438_v4, %v438_v4  ;;  %v3316_v57 = vmul.f32 0.17677669, %v99_v48 }
 0x573   :  { %v470_v22 = vrot.slane %v440_v9, %v3277_v49  ;;  %v3321_v4 = vmul.f32 0.17677669, %v100_v55 }
 0x574   :  { %479 = vrot.lane.b32.xlu1 %v454_v62, %s2994_s29  ;;  %v474_v23 = vrot.slane %v442_v20, %v3277_v49  ;;  %3856 = vst [vmem:[#allocation13_spill] sm:$0xff] %v3316_v57 }
 0x575   :  { %3857 = vst [vmem:[#allocation14_spill] sm:$0xff] %v3321_v4 }
 0x576   :  { %481 = vrot.lane.b32.xlu0 %v458_v3, %s2994_s29 }
 0x578   :  { %483 = vrot.lane.b32.xlu1 %v462_v7, %s2994_s29 }
 0x57a   :  { %485 = vrot.lane.b32.xlu0 %v466_v18, %s2994_s29  ;;  %v3324_v18 = vmul.f32 0.17677669, %v101_v61 }
 0x57c   :  { %487 = vrot.lane.b32.xlu1 %v470_v22, %s2994_s29  ;;  %3858 = vst [vmem:[#allocation15_spill] sm:$0xff] %v3324_v18 }
 0x57e   :  { %489 = vrot.lane.b32.xlu0 %v474_v23, %s2994_s29 }
 0x5e2   :  { %v476_v30 = vpop.permute.xlu1 %475 }
 0x5e3   :  { %v499_v32 = vmul.f32 %v476_v30, %v3300_v27 }
 0x5e4   :  { %v478_v36 = vpop.permute.xlu0 %477 }
 0x5e5   :  { %v500_v39 = vmul.f32 %v478_v36, %v3302_v29  ;;  %v507_v42 = vsel %vm170_vm8, %v499_v32, 0.0  ;;  %v540_v32 = vand.u32 127, %v398_v41 }
 0x5e6   :  { %v480_v47 = vpop.permute.xlu1 %479  ;;  %508 = vadd.xlane.f32.xlu1 %v507_v42 }
 0x5e7   :  { %v501_v50 = vmul.f32 %v480_v47, %v3305_v33  ;;  %v510_v51 = vsel %vm170_vm8, %v500_v39, 0.0  ;;  %v3334_v36 = vsub.s32 %v540_v32, %v3265_v43  ;;  %v3356_v32 = vsub.s32 2, %v3265_v43 }
 0x5e8   :  { %v482_v53 = vpop.permute.xlu0 %481  ;;  %511 = vadd.xlane.f32.xlu0 %v510_v51 }
 0x5e9   :  { %v502_v56 = vmul.f32 %v482_v53, %v3309_v45  ;;  %v513_v0 = vsel %vm170_vm8, %v501_v50, 0.0 }
 0x5ea   :  { %v484_v59 = vpop.permute.xlu1 %483 }
 0x5eb   :  { %v503_v62 = vmul.f32 %v484_v59, %v3313_v52  ;;  %v516_v3 = vsel %vm170_vm8, %v502_v56, 0.0 }
 0x5ec   :  { %v486_v7 = vpop.permute.xlu0 %485  ;;  %514 = vadd.xlane.f32.xlu0 %v513_v0  ;;  %517 = vadd.xlane.f32.xlu1 %v516_v3 }
 0x5ed   :  { %v504_v9 = vmul.f32 %v486_v7, %v3316_v57  ;;  %v519_v23 = vsel %vm170_vm8, %v503_v62, 0.0 }
 0x5ee   :  { %v488_v20 = vpop.permute.xlu1 %487 }
 0x5ef   :  { %v505_v22 = vmul.f32 %v488_v20, %v3321_v4  ;;  %v522_v24 = vsel %vm170_vm8, %v504_v9, 0.0 }
 0x5f0   :  { %v490_v26 = vpop.permute.xlu0 %489  ;;  %520 = vadd.xlane.f32.xlu0 %v519_v23  ;;  %523 = vadd.xlane.f32.xlu1 %v522_v24 }
 0x5f1   :  { %v506_v28 = vmul.f32 %v490_v26, %v3324_v18  ;;  %v525_v30 = vsel %vm170_vm8, %v505_v22, 0.0 }
 0x5f3   :  { %v528_v31 = vsel %vm170_vm8, %v506_v28, 0.0 }
 0x5f4   :  { %526 = vadd.xlane.f32.xlu0 %v525_v30  ;;  %529 = vadd.xlane.f32.xlu1 %v528_v31  ;;  %v2996_v30 = vmov 0   ;;  %v3353_v31 = vsub.s32 1, %v3265_v43 }
 0x5f5   :  { %2774 = vset.pattern.permute.xlu0 %v2996_v30  ;;  %2773 = vset.pattern.permute.xlu1 %v2996_v30 }
 0x673   :  { %v509_v37 = vpop.xlane.xlu1 %508 }
 0x674   :  { %v544_v47 = vrot.slane %v509_v37, %v3334_v36 }
 0x675   :  { %v512_v39 = vpop.xlane.xlu0 %511 }
 0x676   :  { %v548_v42 = vrot.slane %v512_v39, %v3334_v36 }
 0x678   :  { %v573_v53 = vsel %vm149_vm1, %v548_v42, %v544_v47  ;;  %v3359_v42 = vsub.s32 3, %v3265_v43 }
 0x679   :  { %v515_v48 = vpop.xlane.xlu0 %514  ;;  %v518_v50 = vpop.xlane.xlu1 %517 }
 0x67a   :  { %v552_v51 = vrot.slane %v515_v48, %v3334_v36  ;;  %v556_v55 = vrot.slane %v518_v50, %v3334_v36 }
 0x67c   :  { %v574_v56 = vsel %vm152_vm2, %v552_v51, %v573_v53 }
 0x67d   :  { %v521_v41 = vpop.xlane.xlu0 %520  ;;  %v524_v59 = vpop.xlane.xlu1 %523  ;;  %v575_v62 = vsel %vm155_vm3, %v556_v55, %v574_v56 }
 0x67e   :  { %v560_v61 = vrot.slane %v521_v41, %v3334_v36  ;;  %v564_v0 = vrot.slane %v524_v59, %v3334_v36 }
 0x680   :  { %v576_v3 = vsel %vm158_vm4, %v560_v61, %v575_v62  ;;  %v3365_v62 = vsub.s32 4, %v3265_v43 }
 0x681   :  { %v527_v7 = vpop.xlane.xlu0 %526  ;;  %v530_v9 = vpop.xlane.xlu1 %529  ;;  %v577_v23 = vsel %vm161_vm5, %v564_v0, %v576_v3 }
 0x682   :  { %v568_v20 = vrot.slane %v527_v7, %v3334_v36  ;;  %v572_v22 = vrot.slane %v530_v9, %v3334_v36 }
 0x684   :  { %v578_v24 = vsel %vm164_vm6, %v568_v20, %v577_v23  ;;  %v3369_v23 = vsub.s32 5, %v3265_v43 }
 0x685   :  { %v579_v26 = vsel %vm167_vm7, %v572_v22, %v578_v24 }
 0x686   :  { %v582_v28 = vsel %vm581_vm10, %v579_v26, -inf }
 0x687   :  { %583 = vmax.xlane.f32.xlu0 %v582_v28 }
 0x714   :  { %v584_v47 = vpop.xlane.xlu0 %583 }
 0x715   :  { %v589_v51 = vrot.slane %v584_v47, %v3277_v49  ;;  %v593_v53 = vrot.slane %v584_v47, %v3353_v31  ;;  %v597_v55 = vrot.slane %v584_v47, %v3356_v32  ;;  %v601_v0 = vrot.slane %v584_v47, %v3359_v42 }
 0x716   :  { %v605_v24 = vrot.slane %v584_v47, %v3365_v62 }
 0x717   :  { %v627_v56 = vsub.f32 %v512_v39, %v593_v53  ;;  %v626_v61 = vsub.f32 %v509_v37, %v589_v51  ;;  %v628_v3 = vsub.f32 %v515_v48, %v597_v55  ;;  %v629_v28 = vsub.f32 %v518_v50, %v601_v0 }
 0x718   :  { %v3373_v39 = vsub.s32 6, %v3265_v43  ;;  %v609_v37 = vrot.slane %v584_v47, %v3369_v23  ;;  %v630_v51 = vsub.f32 %v521_v41, %v605_v24  ;;  %v3377_v48 = vsub.s32 7, %v3265_v43 }
 0x719   :  { %v636_v20 = vmul.f32 1.442695, %v627_v56  ;;  %v634_v22 = vmul.f32 1.442695, %v626_v61  ;;  %v638_v26 = vmul.f32 1.442695, %v628_v3 }
 0x71a   :  { %v640_v30 = vmul.f32 1.442695, %v629_v28  ;;  %v613_v53 = vrot.slane %v584_v47, %v3373_v39  ;;  %v642_v55 = vmul.f32 1.442695, %v630_v51  ;;  %v631_v56 = vsub.f32 %v524_v59, %v609_v37 }
 0x71b   :  { %2791 = vpow2.f32 %v636_v20  ;;  %v617_v50 = vrot.slane %v584_v47, %v3377_v48 }
 0x71c   :  { %2793 = vpow2.f32 %v634_v22  ;;  %v644_v0 = vmul.f32 1.442695, %v631_v56  ;;  %v632_v3 = vsub.f32 %v527_v7, %v613_v53 }
 0x71d   :  { %2795 = vpow2.f32 %v638_v26  ;;  %v633_v43 = vsub.f32 %v530_v9, %v617_v50 }
 0x71e   :  { %2797 = vpow2.f32 %v640_v30  ;;  %v646_v41 = vmul.f32 1.442695, %v632_v3 }
 0x71f   :  { %2799 = vpow2.f32 %v642_v55  ;;  %v648_v26 = vmul.f32 1.442695, %v633_v43 }
 0x720   :  { %2801 = vpow2.f32 %v644_v0 }
 0x721   :  { %2803 = vpow2.f32 %v646_v41 }
 0x722   :  { %2805 = vpow2.f32 %v648_v26 }
 0x725   :  { %v2792_v61 = vpop.eup %2791 }
 0x726   :  { %v2794_v20 = vpop.eup %2793  ;;  %662 = vperm.xlu0 %2774, %v2792_v61  }
 0x727   :  { %659 = vperm.xlu1 %2773, %v2794_v20   ;;  %v2796_v22 = vpop.eup %2795 }
 0x728   :  { %v2798_v24 = vpop.eup %2797 }
 0x729   :  { %v2800_v28 = vpop.eup %2799 }
 0x72a   :  { %v2802_v59 = vpop.eup %2801 }
 0x72b   :  { %665 = vperm.xlu1 %2773, %v2796_v22   ;;  %v2804_v37 = vpop.eup %2803 }
 0x72c   :  { %v2806_v47 = vpop.eup %2805 }
 0x72f   :  { %668 = vperm.xlu1 %2773, %v2798_v24  }
 0x733   :  { %671 = vperm.xlu1 %2773, %v2800_v28  }
 0x737   :  { %674 = vperm.xlu1 %2773, %v2802_v59  }
 0x73b   :  { %677 = vperm.xlu1 %2773, %v2804_v37  }
 0x73f   :  { %680 = vperm.xlu1 %2773, %v2806_v47  }
 0x7a5   :  { %v663_v55 = vpop.permute.xlu0 %662 }
 0x7a6   :  { %v660_v30 = vpop.permute.xlu1 %659  ;;  %v689_v9 = vrot.slane %v663_v55, %v3334_v36 }
 0x7a7   :  { %v685_v50 = vrot.slane %v660_v30, %v3334_v36 }
 0x7a9   :  { %v714_v26 = vsel %vm149_vm1, %v689_v9, %v685_v50 }
 0x7aa   :  { %v666_v7 = vpop.permute.xlu1 %665 }
 0x7ab   :  { %v693_v0 = vrot.slane %v666_v7, %v3334_v36 }
 0x7ad   :  { %v715_v2 = vsel %vm152_vm2, %v693_v0, %v714_v26 }
 0x7ae   :  { %v669_v51 = vpop.permute.xlu1 %668 }
 0x7af   :  { %v697_v3 = vrot.slane %v669_v51, %v3334_v36 }
 0x7b1   :  { %v716_v4 = vsel %vm155_vm3, %v697_v3, %v715_v2 }
 0x7b2   :  { %v672_v53 = vpop.permute.xlu1 %671 }
 0x7b3   :  { %v701_v41 = vrot.slane %v672_v53, %v3334_v36 }
 0x7b5   :  { %v717_v55 = vsel %vm158_vm4, %v701_v41, %v716_v4 }
 0x7b6   :  { %v675_v56 = vpop.permute.xlu1 %674 }
 0x7b7   :  { %v705_v1 = vrot.slane %v675_v56, %v3334_v36 }
 0x7b9   :  { %v718_v51 = vsel %vm161_vm5, %v705_v1, %v717_v55 }
 0x7ba   :  { %v678_v43 = vpop.permute.xlu1 %677 }
 0x7bb   :  { %v709_v18 = vrot.slane %v678_v43, %v3334_v36 }
 0x7bd   :  { %v719_v53 = vsel %vm164_vm6, %v709_v18, %v718_v51 }
 0x7be   :  { %v681_v30 = vpop.permute.xlu1 %680 }
 0x7bf   :  { %v713_v7 = vrot.slane %v681_v30, %v3334_v36 }
 0x7c1   :  { %v720_v57 = vsel %vm167_vm7, %v713_v7, %v719_v53 }
 0x7c2   :  { %v722_v9 = vsel %vm581_vm10, %v720_v57, 0.0 }
 0x7c3   :  { %723 = vadd.xlane.f32.xlu1 %v722_v9 }
 0x7d4   :  { %958 = vrot.lane.b32.xlu1 %v3236_v8, %s2993_s28 }
 0x850   :  { %v724_v56 = vpop.xlane.xlu1 %723 }
 0x851   :  { %2807 = vrcp.f32 %v724_v56 }
 0x85b   :  { %v2808_v2 = vpop.eup %2807 }
 0x85c   :  { %v734_v4 = vrot.slane %v2808_v2, %v3353_v31  ;;  %v738_v0 = vrot.slane %v2808_v2, %v3356_v32  ;;  %v730_v18 = vrot.slane %v2808_v2, %v3277_v49  ;;  %v742_v57 = vrot.slane %v2808_v2, %v3359_v42 }
 0x85d   :  { %v746_v8 = vrot.slane %v2808_v2, %v3365_v62  ;;  %v750_v26 = vrot.slane %v2808_v2, %v3369_v23  ;;  %v754_v55 = vrot.slane %v2808_v2, %v3373_v39  ;;  %v758_v30 = vrot.slane %v2808_v2, %v3377_v48 }
 0x85e   :  { %v768_v50 = vmul.f32 %v2792_v61, %v734_v4  ;;  %v769_v1 = vmul.f32 %v2796_v22, %v738_v0  ;;  %v767_v3 = vmul.f32 %v2794_v20, %v730_v18  ;;  %v770_v41 = vmul.f32 %v2798_v24, %v742_v57  ;;  %v2506_v24 = vld [vmem:[%s3840_s7] ss:$0 sm:$0xff] }
 0x85f   :  { %v771_v43 = vmul.f32 %v2800_v28, %v746_v8  ;;  %v772_v61 = vmul.f32 %v2802_v59, %v750_v26  ;;  %v773_v22 = vmul.f32 %v2804_v37, %v754_v55  ;;  %v774_v20 = vmul.f32 %v2806_v47, %v758_v30 }
 0x860   :  { %782 = vperm.xlu0 %2774, %v768_v50  }
 0x864   :  { %787 = vperm.xlu0 %2774, %v769_v1  }
 0x868   :  { %777 = vperm.xlu0 %2774, %v767_v3  }
 0x86c   :  { %792 = vperm.xlu0 %2774, %v770_v41  }
 0x870   :  { %797 = vperm.xlu0 %2774, %v771_v43  }
 0x874   :  { %802 = vperm.xlu0 %2774, %v772_v61  }
 0x878   :  { %807 = vperm.xlu0 %2774, %v773_v22  }
 0x87c   :  { %812 = vperm.xlu0 %2774, %v774_v20  }
 0x880   :  { %884 = vrot.lane.b32.xlu0 %v2506_v24, %s2997_s17 }
 0x8df   :  { %v783_v28 = vpop.permute.xlu0 %782 }
 0x8e0   :  { %v816_v7 = vmul.f32 %v783_v28, %v3150_v12 }
 0x8e2   :  { %v830_v51 = vsel %vm170_vm8, %v816_v7, 0.0 }
 0x8e3   :  { %v788_v59 = vpop.permute.xlu0 %787  ;;  %v831_v53 = vrot.slane %v830_v51, 4 }
 0x8e4   :  { %v817_v37 = vmul.f32 %v788_v59, %v3152_v13 }
 0x8e5   :  { %v832_v4 = vadd.f32 %v831_v53, %v830_v51 }
 0x8e6   :  { %v837_v56 = vsel %vm170_vm8, %v817_v37, 0.0 }
 0x8e7   :  { %v3414_v9 = vpop.permute.xlu0 %777  ;;  %v838_v1 = vrot.slane %v837_v56, 4  ;;  %v833_v13 = vrot.slane %v832_v4, 2 }
 0x8e8   :  { %v815_v47 = vmul.f32 %v3414_v9, %v3145_v10 }
 0x8e9   :  { %v839_v8 = vadd.f32 %v838_v1, %v837_v56  ;;  %v834_v55 = vadd.f32 %v833_v13, %v832_v4 }
 0x8ea   :  { %v823_v2 = vsel %vm170_vm8, %v815_v47, 0.0 }
 0x8eb   :  { %v824_v50 = vrot.slane %v823_v2, 4  ;;  %v793_v0 = vpop.permute.xlu0 %792  ;;  %v840_v24 = vrot.slane %v839_v8, 2  ;;  %v835_v51 = vrot.slane %v834_v55, 1 }
 0x8ec   :  { %v818_v12 = vmul.f32 %v793_v0, %v3154_v14 }
 0x8ed   :  { %v825_v18 = vadd.f32 %v824_v50, %v823_v2 }
 0x8ee   :  { %v844_v3 = vsel %vm170_vm8, %v818_v12, 0.0  ;;  %v836_v12 = vadd.f32 %v835_v51, %v834_v55 }
 0x8ef   :  { %v845_v57 = vrot.slane %v844_v3, 4  ;;  %v798_v41 = vpop.permute.xlu0 %797  ;;  %v826_v26 = vrot.slane %v825_v18, 2 }
 0x8f0   :  { %v819_v43 = vmul.f32 %v798_v41, %v3157_v15  ;;  %v841_v15 = vadd.f32 %v840_v24, %v839_v8  ;;  %v3432_v8 = vld [vmem:[%s3841_s8] ss:$0 sm:$0xff] }
 0x8f1   :  { %v846_v10 = vadd.f32 %v845_v57, %v844_v3  ;;  %v827_v7 = vadd.f32 %v826_v26, %v825_v18 }
 0x8f2   :  { %v851_v61 = vsel %vm170_vm8, %v819_v43, 0.0  ;;  %v842_v18 = vrot.slane %v841_v15, 1 }
 0x8f3   :  { %v847_v22 = vrot.slane %v846_v10, 2  ;;  %v852_v30 = vrot.slane %v851_v61, 4  ;;  %v803_v20 = vpop.permute.xlu0 %802  ;;  %v828_v4 = vrot.slane %v827_v7, 1 }
 0x8f4   :  { %v820_v14 = vmul.f32 %v803_v20, %v3159_v16  ;;  %v895_v20 = vmul.f32 %v3432_v8, %v836_v12  ;;  %v843_v24 = vadd.f32 %v842_v18, %v841_v15 }
 0x8f5   :  { %v853_v28 = vadd.f32 %v852_v30, %v851_v61  ;;  %v848_v37 = vadd.f32 %v847_v22, %v846_v10  ;;  %v829_v10 = vadd.f32 %v828_v4, %v827_v7 }
 0x8f6   :  { %v858_v59 = vsel %vm170_vm8, %v820_v14, 0.0  ;;  %v910_v4 = vrot.slane %v895_v20, 7 }
 0x8f7   :  { %v854_v53 = vrot.slane %v853_v28, 2  ;;  %v808_v47 = vpop.permute.xlu0 %807  ;;  %v859_v56 = vrot.slane %v858_v59, 4  ;;  %v849_v3 = vrot.slane %v848_v37, 1  ;;  %v894_v51 = vmul.f32 %v3432_v8, %v829_v10 }
 0x8f8   :  { %v821_v2 = vmul.f32 %v808_v47, %v3161_v17  ;;  %v950_v47 = vsel %vm149_vm1, %v836_v12, %v829_v10 }
 0x8f9   :  { %v855_v50 = vadd.f32 %v854_v53, %v853_v28  ;;  %v860_v0 = vadd.f32 %v859_v56, %v858_v59  ;;  %v850_v22 = vadd.f32 %v849_v3, %v848_v37  ;;  %v896_v37 = vmul.f32 %v3432_v8, %v843_v24 }
 0x8fa   :  { %v865_v1 = vsel %vm170_vm8, %v821_v2, 0.0  ;;  %v951_v3 = vsel %vm152_vm2, %v843_v24, %v950_v47  ;;  %v959_v24 = vpop.permute.xlu1 %958 }
 0x8fb   :  { %v866_v16 = vrot.slane %v865_v1, 4  ;;  %v813_v13 = vpop.permute.xlu0 %812  ;;  %v856_v57 = vrot.slane %v855_v50, 1  ;;  %v861_v41 = vrot.slane %v860_v0, 2  ;;  %v897_v7 = vmul.f32 %v3432_v8, %v850_v22 }
 0x8fc   :  { %v822_v43 = vmul.f32 %v813_v13, %v3166_v21  ;;  %v952_v12 = vsel %vm155_vm3, %v850_v22, %v951_v3 }
 0x8fd   :  { %v867_v17 = vadd.f32 %v866_v16, %v865_v1  ;;  %v862_v26 = vadd.f32 %v861_v41, %v860_v0  ;;  %v857_v14 = vadd.f32 %v856_v57, %v855_v50  ;;  %v911_v16 = vsel %vm149_vm1, %v910_v4, %v894_v51 }
 0x8fe   :  { %v872_v61 = vsel %vm170_vm8, %v822_v43, 0.0  ;;  %v914_v13 = vrot.slane %v897_v7, 5  ;;  %v912_v41 = vrot.slane %v896_v37, 6  ;;  %v3859_v7 = vmov 0.0  }
 0x8ff   :  { %v868_v55 = vrot.slane %v867_v17, 2  ;;  %v873_v30 = vrot.slane %v872_v61, 4  ;;  %v863_v28 = vrot.slane %v862_v26, 1  ;;  %v898_v0 = vmul.f32 %v3432_v8, %v857_v14 }
 0x901   :  { %v869_v59 = vadd.f32 %v868_v55, %v867_v17  ;;  %v874_v21 = vadd.f32 %v873_v30, %v872_v61  ;;  %v864_v53 = vadd.f32 %v863_v28, %v862_v26  ;;  %v916_v43 = vrot.slane %v898_v0, 4 }
 0x902   :  { %v953_v17 = vsel %vm158_vm4, %v857_v14, %v952_v12  ;;  %v913_v30 = vsel %vm152_vm2, %v912_v41, %v911_v16 }
 0x903   :  { %v870_v56 = vrot.slane %v869_v59, 1  ;;  %v875_v2 = vrot.slane %v874_v21, 2  ;;  %v899_v15 = vmul.f32 %v3432_v8, %v864_v53  ;;  %v954_v26 = vsel %vm161_vm5, %v864_v53, %v953_v17 }
 0x905   :  { %v871_v50 = vadd.f32 %v870_v56, %v869_v59  ;;  %v876_v1 = vadd.f32 %v875_v2, %v874_v21  ;;  %v918_v61 = vrot.slane %v899_v15, 3  ;;  %v915_v59 = vsel %vm155_vm3, %v914_v13, %v913_v30 }
 0x906   :  { %v917_v14 = vsel %vm158_vm4, %v916_v43, %v915_v59  ;;  %v3860_v2 = vmov 0.0|0.0  }
 0x907   :  { %v877_v18 = vrot.slane %v876_v1, 1  ;;  %v900_v57 = vmul.f32 %v3432_v8, %v871_v50  ;;  %v955_v55 = vsel %vm164_vm6, %v871_v50, %v954_v26  ;;  %v919_v51 = vsel %vm161_vm5, %v918_v61, %v917_v14 }
 0x909   :  { %v878_v10 = vadd.f32 %v877_v18, %v876_v1  ;;  %v920_v20 = vrot.slane %v900_v57, 2 }
 0x90b   :  { %v956_v28 = vsel %vm167_vm7, %v878_v10, %v955_v55  ;;  %v901_v22 = vmul.f32 %v3432_v8, %v878_v10  ;;  %v921_v47 = vsel %vm164_vm6, %v920_v20, %v919_v51 }
 0x90c   :  { %v961_v21 = vsel %vm170_vm8, %v956_v28, %v959_v24 }
 0x90d   :  { %2626 = vmatmul.mubr.msk.f32.vlgmr.msra.gmra.mrb[2].mxu0 %vm179_vm9, %v961_v21  ;;  %v922_v53 = vrot.slane %v901_v22, 1 }
 0x90e   :  { %2735 = vmatpush3.bf16.msra.mxu0 %v3143_v6  ;;  %2663 = vmatprep.mubr.msk.f32.mxu0 %vm2991_vm0, %v3859_v7  ;;  %v3469_v6 = vpop.permute.xlu0 %884 }
 0x90f   :  { %v923_v56 = vsel %vm167_vm7, %v922_v53, %v921_v47  ;;  %2736 = vmatprep.subr.bf16.mxu0 %v3860_v2  ;;  %v887_v4 = vmul.f32 %v3469_v6, %v3270_v46 }
 0x910   :  { %924 = vrot.lane.b32.xlu0 %v923_v56, %s2997_s17 }
 0x912   :  { %2738 = vmatpush3.bf16.msra.mxu0 %v3148_v11 }
 0x913   :  { %2739 = vmatprep.subr.bf16.mxu0 %v3860_v2 }
 0x916   :  { %2741 = vmatpush3.bf16.msra.mxu0 %v3173_v25  ;;  %v3475_v25 = vld [vmem:[#allocation2] ss:$0 sm:$0xff] }
 0x917   :  { %2742 = vmatprep.subr.bf16.mxu0 %v3860_v2 }
 0x91a   :  { %2744 = vmatpush3.bf16.msra.mxu0 %v3183_v34 }
 0x982   :  { %v925_v37 = vpop.permute.xlu0 %924 }
 0x983   :  { %v927_v0 = vadd.f32 %v925_v37, %v887_v4 }
 0x985   :  { %929 = vrot.lane.b32.xlu0 %v927_v0, %s2994_s29 }
 0x9e0   :  { %v1037_v15 = vpop.f32.mrb[2].mxu0 }
 0x9e1   :  { %v2627_v50 = vpop.f32.mrb[3].mxu0 }
 0x9f7   :  { %v930_v11 = vpop.permute.xlu0 %929 }
 0x9f8   :  { %v932_v1 = vsel %vm170_vm8, %v930_v11, 0.0 }
 0x9f9   :  { %933 = vadd.xlane.f32.xlu0 %v932_v1 }
 0xa86   :  { %v934_v3 = vpop.xlane.xlu0 %933 }
 0xa87   :  { %v3478_v34 = vadd.f32 %v3475_v25, %v934_v3 }
 0xa89   :  { %3861 = vst [vmem:[#allocation16_spill] sm:$0xff] %v3478_v34  ;;  %964 = vperm.xlu1 %2773, %v3478_v34  }
 0xb08   :  { %v965_v16 = vpop.permute.xlu1 %964 }
 0xb09   :  { %v967_v13 = vmul.f32 %v3205_v38, %v965_v16 }
 0xb0b   :  { %v1041_v12 = vadd.f32 %v1037_v15, %v967_v13 }
 0xb0d   :  { %v1042_v18 = vadd.f32 %v3211_v40, %v1041_v12 }
 0xb0f   :  { %2809 = vtanh.f32 %v1042_v18  ;;  %v2510_v41 = vmul.f32 -1.442695, %v1042_v18 }
 0xb11   :  { %2811 = vpow2.f32 %v2510_v41 }
 0xb19   :  { %v2810_v57 = vpop.eup %2809 }
 0xb1a   :  { %1052 = vrot.lane.b32.xlu1 %v2810_v57, %s2993_s28 }
 0xb1b   :  { %v2812_v43 = vpop.eup %2811 }
 0xb1c   :  { %v1046_v17 = vadd.f32 1.0, %v2812_v43 }
 0xb1e   :  { %2813 = vrcp.f32 %v1046_v17 }
 0xb28   :  { %v2814_v10 = vpop.eup %2813 }
 0xb29   :  { %v1050_v55 = vmul.f32 %v2814_v10, %v3216_v54 }
 0xb8c   :  { %v1053_v26 = vpop.permute.xlu1 %1052 }
 0xb8d   :  { %v1055_v61 = vmul.f32 %v2814_v10, %v1053_v26 }
 0xb8f   :  { %1057 = vrot.lane.b32.xlu1 %v1055_v61, %s2994_s29 }
 0xc01   :  { %v1058_v38 = vpop.permute.xlu1 %1057 }
 0xc02   :  { %v3486_v30 = vadd.f32 %v1058_v38, %v1050_v55 }
 0xc04   :  { %2815 = vtanh.f32 %v3486_v30 }
 0xc0e   :  { %v2816_v40 = vpop.eup %2815 }
 0xc0f   :  { %1063 = vrot.lane.b32.xlu1 %v2816_v40, %s2993_s28 }
 0xc81   :  { %v1064_v20 = vpop.permute.xlu1 %1063 }
 0xc82   :  { %v3490_v24 = vmul.f32 %v2814_v10, %v1064_v20 }
 0xc84   :  { %1068 = vrot.lane.b32.xlu1 %v3490_v24, %s2994_s29 }
 0xc88   :  { %1071 = vrot.lane.b32.xlu1 %v3270_v46, %s2993_s28 }
 0xcf6   :  { %v1069_v28 = vpop.permute.xlu1 %1068 }
 0xcfa   :  { %v1072_v22 = vpop.permute.xlu1 %1071 }
 0xcfb   :  { %v1074_v54 = vsel %vm170_vm8, %v1069_v28, %v1072_v22 }
 0xcfc   :  { %2645 = vmatmul.mubr.msk.f32.vlgmr.msra.gmra.mrb[2].mxu1 %vm179_vm9, %v1074_v54 }
 0xcfd   :  { %2747 = vmatpush3.bf16.msra.mxu1 %v3219_v58  ;;  %2682 = vmatprep.mubr.msk.f32.mxu1 %vm2991_vm0, %v3859_v7  ;;  %vm2465_vm0 = vcmask 23552  }
 0xcfe   :  { %2748 = vmatprep.subr.bf16.mxu1 %v3860_v2 }
 0xd01   :  { %2750 = vmatpush3.bf16.msra.mxu1 %v3222_v60 }
 0xd02   :  { %2751 = vmatprep.subr.bf16.mxu1 %v3860_v2 }
 0xd05   :  { %2753 = vmatpush3.bf16.msra.mxu1 %v3226_v63 }
 0xd06   :  { %2754 = vmatprep.subr.bf16.mxu1 %v3860_v2 }
 0xd09   :  { %2756 = vmatpush3.bf16.msra.mxu1 %v3231_v5 }
 0xdcf   :  { %v1144_v46 = vpop.f32.mrb[2].mxu1 }
 0xdd0   :  { %v1145_v59 = vadd.f32 %v3255_v19, %v1144_v46  ;;  %v2646_v21 = vpop.f32.mrb[3].mxu1 }
 0xdd2   :  { %2817 = vtanh.f32 %v1145_v59  ;;  %v2512_v14 = vmul.f32 -1.442695, %v1145_v59 }
 0xdd4   :  { %2819 = vpow2.f32 %v2512_v14 }
 0xddc   :  { %v2818_v58 = vpop.eup %2817 }
 0xddd   :  { %1157 = vrot.lane.b32.xlu1 %v2818_v58, %s2993_s28 }
 0xdde   :  { %v2820_v51 = vpop.eup %2819 }
 0xddf   :  { %v1151_v60 = vadd.f32 1.0, %v2820_v51 }
 0xde1   :  { %2821 = vrcp.f32 %v1151_v60 }
 0xdeb   :  { %v2822_v53 = vpop.eup %2821 }
 0xdec   :  { %v1155_v5 = vmul.f32 %v2822_v53, %v3260_v35 }
 0xe4f   :  { %v1158_v47 = vpop.permute.xlu1 %1157 }
 0xe50   :  { %v1160_v63 = vmul.f32 %v2822_v53, %v1158_v47 }
 0xe52   :  { %1162 = vrot.lane.b32.xlu0 %v1160_v63, %s2994_s29 }
 0xec4   :  { %v1163_v7 = vpop.permute.xlu0 %1162 }
 0xec5   :  { %v3511_v56 = vadd.f32 %v1163_v7, %v1155_v5  ;;  %v3862_v5 = vld [vmem:[#allocation13_spill] sm:$0xff] }
 0xec7   :  { %2823 = vtanh.f32 %v3511_v56 }
 0xed1   :  { %v2824_v19 = vpop.eup %2823 }
 0xed2   :  { %1168 = vrot.lane.b32.xlu1 %v2824_v19, %s2993_s28 }
 0xf44   :  { %v1169_v2 = vpop.permute.xlu1 %1168 }
 0xf45   :  { %v3515_v4 = vmul.f32 %v2822_v53, %v1169_v2 }
 0xf47   :  { %v1173_v37 = vcombine.high %v3515_v4, %v3515_v4  ;;  %v1180_v0 = vrot.slane %v3515_v4, %v3268_v44 }
 0xf49   :  { %v1196_v15 = vrot.slane %v1180_v0, %v3268_v44  ;;  %v1188_v35 = vcombine.high %v1180_v0, %v1180_v0  ;;  %v1187_v50 = vrot.slane %v1173_v37, %v3268_v44  ;;  %v3863_v0 = vld [vmem:[#allocation14_spill] sm:$0xff] }
 0xf4b   :  { %v1225_v11 = vrot.slane %v1196_v15, %v3277_v49  ;;  %v1210_v1 = vrot.slane %v1188_v35, %v3268_v44  ;;  %v1189_v3 = vcombine.high %v1187_v50, %v1187_v50  ;;  %v1218_v18 = vcombine.high %v1196_v15, %v1196_v15  ;;  %v3864_v35 = vld [vmem:[#allocation15_spill] sm:$0xff] }
 0xf4c   :  { %v1203_v17 = vrot.slane %v1187_v50, %v3268_v44 }
 0xf4d   :  { %1254 = vrot.lane.b32.xlu1 %v1225_v11, %s2994_s29  ;;  %v1217_v16 = vrot.slane %v1189_v3, %v3268_v44  ;;  %v1229_v13 = vrot.slane %v1210_v1, %v3277_v49  ;;  %v1233_v41 = vrot.slane %v1218_v18, %v3277_v49  ;;  %v1220_v26 = vcombine.high %v1210_v1, %v1210_v1 }
 0xf4e   :  { %v1241_v10 = vrot.slane %v1203_v17, %v3277_v49  ;;  %v1219_v55 = vcombine.high %v1203_v17, %v1203_v17 }
 0xf4f   :  { %v1245_v12 = vrot.slane %v1217_v16, %v3277_v49  ;;  %v1221_v57 = vcombine.high %v1217_v16, %v1217_v16  ;;  %v1237_v61 = vrot.slane %v1220_v26, %v3277_v49 }
 0xf50   :  { %v1249_v38 = vrot.slane %v1219_v55, %v3277_v49 }
 0xf51   :  { %1256 = vrot.lane.b32.xlu1 %v1229_v13, %s2994_s29  ;;  %1264 = vrot.lane.b32.xlu0 %v1245_v12, %s2994_s29  ;;  %v1253_v43 = vrot.slane %v1221_v57, %v3277_v49 }
 0xf55   :  { %1258 = vrot.lane.b32.xlu1 %v1233_v41, %s2994_s29  ;;  %1268 = vrot.lane.b32.xlu0 %v1253_v43, %s2994_s29 }
 0xf59   :  { %1262 = vrot.lane.b32.xlu1 %v1241_v10, %s2994_s29 }
 0xf5d   :  { %1260 = vrot.lane.b32.xlu1 %v1237_v61, %s2994_s29 }
 0xf61   :  { %1266 = vrot.lane.b32.xlu1 %v1249_v38, %s2994_s29 }
 0xfbf   :  { %v1255_v40 = vpop.permute.xlu1 %1254 }
 0xfc0   :  { %v1278_v20 = vmul.f32 %v1255_v40, %v3300_v27 }
 0xfc2   :  { %v1286_v28 = vsel %vm170_vm8, %v1278_v20, 0.0 }
 0xfc3   :  { %v1257_v22 = vpop.permute.xlu1 %1256  ;;  %1287 = vadd.xlane.f32.xlu1 %v1286_v28  ;;  %v1265_v60 = vpop.permute.xlu0 %1264 }
 0xfc4   :  { %v1279_v54 = vmul.f32 %v1257_v22, %v3302_v29  ;;  %v1283_v7 = vmul.f32 %v1265_v60, %v3862_v5 }
 0xfc6   :  { %v1289_v46 = vsel %vm170_vm8, %v1279_v54, 0.0  ;;  %v1301_v11 = vsel %vm170_vm8, %v1283_v7, 0.0 }
 0xfc7   :  { %v1259_v59 = vpop.permute.xlu1 %1258  ;;  %1290 = vadd.xlane.f32.xlu0 %v1289_v46  ;;  %v1269_v2 = vpop.permute.xlu0 %1268 }
 0xfc8   :  { %v1280_v21 = vmul.f32 %v1259_v59, %v3305_v33  ;;  %v1285_v50 = vmul.f32 %v1269_v2, %v3864_v35 }
 0xfca   :  { %v1292_v58 = vsel %vm170_vm8, %v1280_v21, 0.0  ;;  %v1307_v3 = vsel %vm170_vm8, %v1285_v50, 0.0 }
 0xfcb   :  { %v1263_v14 = vpop.permute.xlu1 %1262  ;;  %1293 = vadd.xlane.f32.xlu0 %v1292_v58 }
 0xfcc   :  { %v1282_v51 = vmul.f32 %v1263_v14, %v3313_v52 }
 0xfce   :  { %v1298_v53 = vsel %vm170_vm8, %v1282_v51, 0.0 }
 0xfcf   :  { %v1261_v47 = vpop.permute.xlu1 %1260  ;;  %1299 = vadd.xlane.f32.xlu0 %v1298_v53 }
 0xfd0   :  { %v1281_v63 = vmul.f32 %v1261_v47, %v3309_v45 }
 0xfd2   :  { %v1295_v19 = vsel %vm170_vm8, %v1281_v63, 0.0 }
 0xfd3   :  { %1296 = vadd.xlane.f32.xlu1 %v1295_v19  ;;  %v1267_v37 = vpop.permute.xlu1 %1266 }
 0xfd4   :  { %v1284_v15 = vmul.f32 %v1267_v37, %v3863_v0 }
 0xfd6   :  { %v1304_v1 = vsel %vm170_vm8, %v1284_v15, 0.0 }
 0xfd7   :  { %1302 = vadd.xlane.f32.xlu1 %v1301_v11  ;;  %1305 = vadd.xlane.f32.xlu0 %v1304_v1 }
 0xfdb   :  { %1308 = vadd.xlane.f32.xlu1 %v1307_v3 }
0x1050   :  { %v1288_v12 = vpop.xlane.xlu1 %1287 }
0x1051   :  { %v1321_v41 = vrot.slane %v1288_v12, %v3334_v36 }
0x1054   :  { %v1291_v16 = vpop.xlane.xlu0 %1290 }
0x1055   :  { %v1325_v18 = vrot.slane %v1291_v16, %v3334_v36 }
0x1057   :  { %v1350_v10 = vsel %vm149_vm1, %v1325_v18, %v1321_v41 }
0x1058   :  { %v1294_v13 = vpop.xlane.xlu0 %1293 }
0x1059   :  { %v1329_v57 = vrot.slane %v1294_v13, %v3334_v36 }
0x105b   :  { %v1351_v61 = vsel %vm152_vm2, %v1329_v57, %v1350_v10 }
0x105c   :  { %v1300_v43 = vpop.xlane.xlu0 %1299 }
0x105d   :  { %v1337_v38 = vrot.slane %v1300_v43, %v3334_v36 }
0x1060   :  { %v1297_v17 = vpop.xlane.xlu1 %1296 }
0x1061   :  { %v1333_v26 = vrot.slane %v1297_v17, %v3334_v36 }
0x1063   :  { %v1352_v55 = vsel %vm155_vm3, %v1333_v26, %v1351_v61 }
0x1064   :  { %v1303_v40 = vpop.xlane.xlu1 %1302  ;;  %v1306_v20 = vpop.xlane.xlu0 %1305  ;;  %v1353_v54 = vsel %vm158_vm4, %v1337_v38, %v1352_v55 }
0x1065   :  { %v1341_v28 = vrot.slane %v1303_v40, %v3334_v36  ;;  %v1345_v22 = vrot.slane %v1306_v20, %v3334_v36 }
0x1067   :  { %v1354_v46 = vsel %vm161_vm5, %v1341_v28, %v1353_v54 }
0x1068   :  { %v1309_v59 = vpop.xlane.xlu1 %1308  ;;  %v1355_v58 = vsel %vm164_vm6, %v1345_v22, %v1354_v46 }
0x1069   :  { %v1349_v21 = vrot.slane %v1309_v59, %v3334_v36 }
0x106b   :  { %v1356_v14 = vsel %vm167_vm7, %v1349_v21, %v1355_v58 }
0x106c   :  { %v1358_v51 = vsel %vm581_vm10, %v1356_v14, -inf }
0x106d   :  { %1359 = vmax.xlane.f32.xlu0 %v1358_v51 }
0x10fa   :  { %v1360_v60 = vpop.xlane.xlu0 %1359 }
0x10fb   :  { %v1365_v53 = vrot.slane %v1360_v60, %v3277_v49  ;;  %v1369_v47 = vrot.slane %v1360_v60, %v3353_v31  ;;  %v1373_v63 = vrot.slane %v1360_v60, %v3356_v32  ;;  %v1381_v7 = vrot.slane %v1360_v60, %v3365_v62 }
0x10fc   :  { %v1377_v19 = vrot.slane %v1360_v60, %v3359_v42  ;;  %v1389_v50 = vrot.slane %v1360_v60, %v3373_v39  ;;  %v1385_v18 = vrot.slane %v1360_v60, %v3369_v23  ;;  %v1393_v61 = vrot.slane %v1360_v60, %v3377_v48 }
0x10fd   :  { %v1402_v2 = vsub.f32 %v1288_v12, %v1365_v53  ;;  %v1403_v37 = vsub.f32 %v1291_v16, %v1369_v47  ;;  %v1404_v15 = vsub.f32 %v1294_v13, %v1373_v63  ;;  %v1406_v11 = vsub.f32 %v1300_v43, %v1381_v7 }
0x10fe   :  { %v1405_v57 = vsub.f32 %v1297_v17, %v1377_v19  ;;  %v1408_v10 = vsub.f32 %v1306_v20, %v1389_v50  ;;  %v1407_v55 = vsub.f32 %v1303_v40, %v1385_v18  ;;  %v1409_v13 = vsub.f32 %v1309_v59, %v1393_v61 }
0x10ff   :  { %v1410_v1 = vmul.f32 1.442695, %v1402_v2  ;;  %v1412_v3 = vmul.f32 1.442695, %v1403_v37  ;;  %v1414_v41 = vmul.f32 1.442695, %v1404_v15 }
0x1100   :  { %v1418_v26 = vmul.f32 1.442695, %v1406_v11  ;;  %v1416_v12 = vmul.f32 1.442695, %v1405_v57  ;;  %v1422_v16 = vmul.f32 1.442695, %v1408_v10 }
0x1101   :  { %2825 = vpow2.f32 %v1410_v1  ;;  %v1420_v43 = vmul.f32 1.442695, %v1407_v55  ;;  %v1424_v17 = vmul.f32 1.442695, %v1409_v13 }
0x1102   :  { %2827 = vpow2.f32 %v1412_v3 }
0x1103   :  { %2829 = vpow2.f32 %v1414_v41 }
0x1104   :  { %2831 = vpow2.f32 %v1418_v26 }
0x1105   :  { %2833 = vpow2.f32 %v1416_v12 }
0x1106   :  { %2835 = vpow2.f32 %v1422_v16 }
0x1107   :  { %2837 = vpow2.f32 %v1420_v43 }
0x1108   :  { %2839 = vpow2.f32 %v1424_v17 }
0x110b   :  { %v2826_v38 = vpop.eup %2825 }
0x110c   :  { %v2828_v28 = vpop.eup %2827  ;;  %1435 = vperm.xlu1 %2773, %v2826_v38  }
0x110d   :  { %1438 = vperm.xlu0 %2774, %v2828_v28   ;;  %v2830_v20 = vpop.eup %2829 }
0x110e   :  { %v2832_v22 = vpop.eup %2831 }
0x110f   :  { %v2834_v40 = vpop.eup %2833 }
0x1110   :  { %1441 = vperm.xlu1 %2773, %v2830_v20   ;;  %v2836_v54 = vpop.eup %2835 }
0x1111   :  { %1447 = vperm.xlu0 %2774, %v2832_v22   ;;  %v2838_v46 = vpop.eup %2837 }
0x1112   :  { %v2840_v59 = vpop.eup %2839 }
0x1114   :  { %1444 = vperm.xlu1 %2773, %v2834_v40  }
0x1115   :  { %1453 = vperm.xlu0 %2774, %v2836_v54  }
0x1118   :  { %1450 = vperm.xlu1 %2773, %v2838_v46  }
0x111c   :  { %1456 = vperm.xlu1 %2773, %v2840_v59  }
0x118b   :  { %v1436_v21 = vpop.permute.xlu1 %1435 }
0x118c   :  { %v1439_v58 = vpop.permute.xlu0 %1438  ;;  %v1461_v60 = vrot.slane %v1436_v21, %v3334_v36 }
0x118d   :  { %v1465_v51 = vrot.slane %v1439_v58, %v3334_v36 }
0x118f   :  { %v1442_v14 = vpop.permute.xlu1 %1441  ;;  %v1490_v7 = vsel %vm149_vm1, %v1465_v51, %v1461_v60 }
0x1190   :  { %v1469_v53 = vrot.slane %v1442_v14, %v3334_v36  ;;  %v1448_v47 = vpop.permute.xlu0 %1447 }
0x1191   :  { %v1477_v15 = vrot.slane %v1448_v47, %v3334_v36 }
0x1192   :  { %v1491_v2 = vsel %vm152_vm2, %v1469_v53, %v1490_v7 }
0x1193   :  { %v1445_v63 = vpop.permute.xlu1 %1444 }
0x1194   :  { %v1473_v19 = vrot.slane %v1445_v63, %v3334_v36  ;;  %v1454_v11 = vpop.permute.xlu0 %1453 }
0x1195   :  { %v1485_v57 = vrot.slane %v1454_v11, %v3334_v36 }
0x1196   :  { %v1492_v37 = vsel %vm155_vm3, %v1473_v19, %v1491_v2  ;;  %v3608_v2 = vld [vmem:[#allocation5 + $0x8] sm:$0xff] }
0x1197   :  { %v1451_v50 = vpop.permute.xlu1 %1450  ;;  %v1493_v3 = vsel %vm158_vm4, %v1477_v15, %v1492_v37  ;;  %v3612_v15 = vld [vmem:[#allocation5 + $0x10] sm:$0xff] }
0x1198   :  { %v1481_v1 = vrot.slane %v1451_v50, %v3334_v36 }
0x119a   :  { %v1494_v18 = vsel %vm161_vm5, %v1481_v1, %v1493_v3 }
0x119b   :  { %v1457_v41 = vpop.permute.xlu1 %1456  ;;  %v1495_v26 = vsel %vm164_vm6, %v1485_v57, %v1494_v18 }
0x119c   :  { %v1489_v10 = vrot.slane %v1457_v41, %v3334_v36 }
0x119e   :  { %v1496_v61 = vsel %vm167_vm7, %v1489_v10, %v1495_v26  ;;  %v3623_v26 = vld [vmem:[#allocation5 + $0x18] sm:$0xff] }
0x119f   :  { %v1498_v55 = vsel %vm581_vm10, %v1496_v61, 0.0 }
0x11a0   :  { %1499 = vadd.xlane.f32.xlu0 %v1498_v55 }
0x11b6   :  { %1714 = vrot.lane.b32.xlu0 %v3490_v24, %s2993_s28 }
0x122d   :  { %v1500_v12 = vpop.xlane.xlu0 %1499 }
0x122e   :  { %2841 = vrcp.f32 %v1500_v12 }
0x1238   :  { %v2842_v16 = vpop.eup %2841 }
0x1239   :  { %v1510_v13 = vrot.slane %v2842_v16, %v3353_v31  ;;  %v1514_v17 = vrot.slane %v2842_v16, %v3356_v32  ;;  %v1506_v58 = vrot.slane %v2842_v16, %v3277_v49  ;;  %v1518_v51 = vrot.slane %v2842_v16, %v3359_v42 }
0x123a   :  { %v1522_v24 = vrot.slane %v2842_v16, %v3365_v62  ;;  %v1526_v47 = vrot.slane %v2842_v16, %v3369_v23  ;;  %v1530_v63 = vrot.slane %v2842_v16, %v3373_v39  ;;  %v1534_v7 = vrot.slane %v2842_v16, %v3377_v48 }
0x123b   :  { %v1544_v43 = vmul.f32 %v2828_v28, %v1510_v13  ;;  %v1545_v21 = vmul.f32 %v2830_v20, %v1514_v17  ;;  %v1543_v14 = vmul.f32 %v2826_v38, %v1506_v58  ;;  %v1546_v60 = vmul.f32 %v2834_v40, %v1518_v51 }
0x123c   :  { %v1547_v53 = vmul.f32 %v2832_v22, %v1522_v24  ;;  %v1548_v28 = vmul.f32 %v2838_v46, %v1526_v47  ;;  %v1549_v20 = vmul.f32 %v2836_v54, %v1530_v63  ;;  %v1550_v38 = vmul.f32 %v2840_v59, %v1534_v7  ;;  %v3617_v54 = vld [vmem:[#allocation5] sm:$0xff] }
0x123d   :  { %1558 = vperm.xlu1 %2773, %v1544_v43  }
0x1241   :  { %1563 = vperm.xlu1 %2773, %v1545_v21   ;;  %v3627_v21 = vld [vmem:[#allocation5 + $0x20] sm:$0xff] }
0x1245   :  { %1553 = vperm.xlu1 %2773, %v1543_v14  }
0x1249   :  { %1568 = vperm.xlu1 %2773, %v1546_v60  }
0x124d   :  { %1573 = vperm.xlu1 %2773, %v1547_v53  }
0x1251   :  { %1578 = vperm.xlu1 %2773, %v1548_v28  }
0x1255   :  { %1583 = vperm.xlu1 %2773, %v1549_v20   ;;  %v3631_v20 = vld [vmem:[#allocation5 + $0x28] sm:$0xff] }
0x1259   :  { %1588 = vperm.xlu1 %2773, %v1550_v38  }
0x12bc   :  { %v1559_v19 = vpop.permute.xlu1 %1558 }
0x12bd   :  { %v1592_v40 = vmul.f32 %v3608_v2, %v1559_v19 }
0x12bf   :  { %v1606_v22 = vsel %vm170_vm8, %v1592_v40, 0.0 }
0x12c0   :  { %v1564_v37 = vpop.permute.xlu1 %1563  ;;  %v1607_v50 = vrot.slane %v1606_v22, 4 }
0x12c1   :  { %v1593_v46 = vmul.f32 %v3612_v15, %v1564_v37 }
0x12c2   :  { %v1608_v18 = vadd.f32 %v1607_v50, %v1606_v22 }
0x12c3   :  { %v1613_v1 = vsel %vm170_vm8, %v1593_v46, 0.0 }
0x12c4   :  { %v3615_v11 = vpop.permute.xlu1 %1553  ;;  %v1614_v10 = vrot.slane %v1613_v1, 4  ;;  %v1609_v16 = vrot.slane %v1608_v18, 2 }
0x12c5   :  { %v1591_v59 = vmul.f32 %v3617_v54, %v3615_v11 }
0x12c6   :  { %v1615_v17 = vadd.f32 %v1614_v10, %v1613_v1  ;;  %v1610_v24 = vadd.f32 %v1609_v16, %v1608_v18 }
0x12c7   :  { %v1599_v3 = vsel %vm170_vm8, %v1591_v59, 0.0 }
0x12c8   :  { %v1600_v57 = vrot.slane %v1599_v3, 4  ;;  %v1569_v41 = vpop.permute.xlu1 %1568  ;;  %v1616_v63 = vrot.slane %v1615_v17, 2  ;;  %v1611_v37 = vrot.slane %v1610_v24, 1 }
0x12c9   :  { %v1594_v61 = vmul.f32 %v3623_v26, %v1569_v41 }
0x12ca   :  { %v1601_v55 = vadd.f32 %v1600_v57, %v1599_v3  ;;  %v1617_v59 = vadd.f32 %v1616_v63, %v1615_v17  ;;  %v3635_v3 = vld [vmem:[#allocation5 + $0x30] sm:$0xff] }
0x12cb   :  { %v1620_v12 = vsel %vm170_vm8, %v1594_v61, 0.0 }
0x12cc   :  { %v1621_v13 = vrot.slane %v1620_v12, 4  ;;  %v1574_v43 = vpop.permute.xlu1 %1573  ;;  %v1602_v51 = vrot.slane %v1601_v55, 2 }
0x12cd   :  { %v1595_v58 = vmul.f32 %v3627_v21, %v1574_v43  ;;  %v1618_v43 = vrot.slane %v1617_v59, 1 }
0x12ce   :  { %v1622_v14 = vadd.f32 %v1621_v13, %v1620_v12  ;;  %v1603_v19 = vadd.f32 %v1602_v51, %v1601_v55  ;;  %v1612_v12 = vadd.f32 %v1611_v37, %v1610_v24  ;;  %v3639_v51 = vld [vmem:[#allocation5 + $0x38] sm:$0xff] }
0x12cf   :  { %v1627_v60 = vsel %vm170_vm8, %v1595_v58, 0.0 }
0x12d0   :  { %v1623_v53 = vrot.slane %v1622_v14, 2  ;;  %v1628_v47 = vrot.slane %v1627_v60, 4  ;;  %v1579_v28 = vpop.permute.xlu1 %1578  ;;  %v1604_v41 = vrot.slane %v1603_v19, 1  ;;  %v1657_v24 = vmul.f32 %v3432_v8, %v1612_v12 }
0x12d1   :  { %v1596_v7 = vmul.f32 %v3631_v20, %v1579_v28 }
0x12d2   :  { %v1629_v38 = vadd.f32 %v1628_v47, %v1627_v60  ;;  %v1624_v22 = vadd.f32 %v1623_v53, %v1622_v14  ;;  %v1605_v53 = vadd.f32 %v1604_v41, %v1603_v19 }
0x12d3   :  { %v1634_v40 = vsel %vm170_vm8, %v1596_v7, 0.0 }
0x12d4   :  { %v1630_v46 = vrot.slane %v1629_v38, 2  ;;  %v1584_v50 = vpop.permute.xlu1 %1583  ;;  %v1635_v1 = vrot.slane %v1634_v40, 4  ;;  %v1625_v16 = vrot.slane %v1624_v22, 1 }
0x12d5   :  { %v1597_v18 = vmul.f32 %v3635_v3, %v1584_v50 }
0x12d6   :  { %v1631_v57 = vadd.f32 %v1630_v46, %v1629_v38  ;;  %v1636_v10 = vadd.f32 %v1635_v1, %v1634_v40  ;;  %v1626_v63 = vadd.f32 %v1625_v16, %v1624_v22  ;;  %v1619_v40 = vadd.f32 %v1618_v43, %v1617_v59 }
0x12d7   :  { %v1641_v61 = vsel %vm170_vm8, %v1597_v18, 0.0  ;;  %v1656_v18 = vmul.f32 %v3432_v8, %v1605_v53 }
0x12d8   :  { %v1642_v55 = vrot.slane %v1641_v61, 4  ;;  %v1589_v13 = vpop.permute.xlu1 %1588  ;;  %v1632_v58 = vrot.slane %v1631_v57, 1  ;;  %v1637_v14 = vrot.slane %v1636_v10, 2  ;;  %v1659_v19 = vmul.f32 %v3432_v8, %v1626_v63 }
0x12d9   :  { %v1598_v17 = vmul.f32 %v3639_v51, %v1589_v13  ;;  %v1706_v13 = vsel %vm149_vm1, %v1612_v12, %v1605_v53  ;;  %v1658_v22 = vmul.f32 %v3432_v8, %v1619_v40 }
0x12da   :  { %v1643_v60 = vadd.f32 %v1642_v55, %v1641_v61  ;;  %v1638_v47 = vadd.f32 %v1637_v14, %v1636_v10  ;;  %v1633_v37 = vadd.f32 %v1632_v58, %v1631_v57  ;;  %v1672_v61 = vrot.slane %v1657_v24, 7 }
0x12db   :  { %v1648_v28 = vsel %vm170_vm8, %v1598_v17, 0.0  ;;  %v1707_v58 = vsel %vm152_vm2, %v1619_v40, %v1706_v13  ;;  %v1676_v14 = vrot.slane %v1659_v19, 5  ;;  %v1674_v53 = vrot.slane %v1658_v22, 6  ;;  %v1715_v40 = vpop.permute.xlu0 %1714 }
0x12dc   :  { %v1644_v7 = vrot.slane %v1643_v60, 2  ;;  %v1649_v38 = vrot.slane %v1648_v28, 4  ;;  %v1639_v46 = vrot.slane %v1638_v47, 1  ;;  %v1660_v16 = vmul.f32 %v3432_v8, %v1633_v37 }
0x12dd   :  { %v1673_v43 = vsel %vm149_vm1, %v1672_v61, %v1656_v18  ;;  %v1708_v12 = vsel %vm155_vm3, %v1626_v63, %v1707_v58 }
0x12de   :  { %v1645_v50 = vadd.f32 %v1644_v7, %v1643_v60  ;;  %v1650_v1 = vadd.f32 %v1649_v38, %v1648_v28  ;;  %v1640_v34 = vadd.f32 %v1639_v46, %v1638_v47  ;;  %v1678_v47 = vrot.slane %v1660_v16, 4 }
0x12df   :  { %v1709_v28 = vsel %vm158_vm4, %v1633_v37, %v1708_v12 }
0x12e0   :  { %v1646_v41 = vrot.slane %v1645_v50, 1  ;;  %v1651_v10 = vrot.slane %v1650_v1, 2  ;;  %v1661_v59 = vmul.f32 %v3432_v8, %v1640_v34  ;;  %v1710_v38 = vsel %vm161_vm5, %v1640_v34, %v1709_v28 }
0x12e2   :  { %v1647_v57 = vadd.f32 %v1646_v41, %v1645_v50  ;;  %v1652_v55 = vadd.f32 %v1651_v10, %v1650_v1  ;;  %v1680_v7 = vrot.slane %v1661_v59, 3  ;;  %v1675_v1 = vsel %vm152_vm2, %v1674_v53, %v1673_v43 }
0x12e3   :  { %v1677_v13 = vsel %vm155_vm3, %v1676_v14, %v1675_v1 }
0x12e4   :  { %v1662_v17 = vmul.f32 %v3432_v8, %v1647_v57  ;;  %v1653_v60 = vrot.slane %v1652_v55, 1  ;;  %v1711_v50 = vsel %vm164_vm6, %v1647_v57, %v1710_v38  ;;  %v1679_v37 = vsel %vm158_vm4, %v1678_v47, %v1677_v13  ;;  %v2886_v47 = vld [vmem:[%s3837_s4] ss:$0 sm:$0xff] }
0x12e5   :  { %v1681_v34 = vsel %vm161_vm5, %v1680_v7, %v1679_v37 }
0x12e6   :  { %v1654_v24 = vadd.f32 %v1653_v60, %v1652_v55  ;;  %v1682_v46 = vrot.slane %v1662_v17, 2  ;;  %v2885_v17 = vld [vmem:[%s3835_s2] ss:$0 sm:$0xff] }
0x12e8   :  { %v1712_v18 = vsel %vm167_vm7, %v1654_v24, %v1711_v50  ;;  %v1663_v63 = vmul.f32 %v3432_v8, %v1654_v24  ;;  %v1683_v10 = vsel %vm164_vm6, %v1682_v46, %v1681_v34  ;;  %v1655_v8 = vmul.f32 %v3515_v4, %v3469_v6 }
0x12e9   :  { %v1717_v19 = vsel %vm170_vm8, %v1712_v18, %v1715_v40 }
0x12ea   :  { %2664 = vmatmul.mubr.msk.f32.vlgmr.msra.gmra.mrb[4].mxu0 %vm179_vm9, %v1717_v19  ;;  %v1684_v41 = vrot.slane %v1663_v63, 1 }
0x12ec   :  { %v1685_v61 = vsel %vm167_vm7, %v1684_v41, %v1683_v10 }
0x12ed   :  { %1686 = vrot.lane.b32.xlu1 %v1685_v61, %s2997_s17  ;;  %v2887_v61 = vld [vmem:[%s3839_s6] ss:$0 sm:$0xff] }
0x135f   :  { %v1687_v22 = vpop.permute.xlu1 %1686 }
0x1360   :  { %v1689_v16 = vadd.f32 %v1687_v22, %v1655_v8 }
0x1362   :  { %1691 = vrot.lane.b32.xlu1 %v1689_v16, %s2994_s29 }
0x13bd   :  { %v1793_v59 = vpop.f32.mrb[4].mxu0 }
0x13be   :  { %v2665_v57 = vpop.f32.mrb[5].mxu0 }
0x13d4   :  { %v1692_v55 = vpop.permute.xlu1 %1691 }
0x13d5   :  { %v1694_v43 = vsel %vm170_vm8, %v1692_v55, 0.0 }
0x13d6   :  { %1695 = vadd.xlane.f32.xlu1 %v1694_v43 }
0x1463   :  { %v1696_v58 = vpop.xlane.xlu1 %1695 }
0x1464   :  { %v3673_v14 = vadd.f32 %v3475_v25, %v1696_v58 }
0x1466   :  { %1720 = vperm.xlu0 %2774, %v3673_v14  }
0x14e5   :  { %v1721_v12 = vpop.permute.xlu0 %1720 }
0x14e6   :  { %v1723_v60 = vmul.f32 %v2885_v17, %v1721_v12 }
0x14e8   :  { %v1797_v53 = vadd.f32 %v1793_v59, %v1723_v60 }
0x14ea   :  { %v1798_v28 = vadd.f32 %v2886_v47, %v1797_v53 }
0x14ec   :  { %2843 = vtanh.f32 %v1798_v28  ;;  %v2514_v25 = vmul.f32 -1.442695, %v1798_v28 }
0x14ee   :  { %2845 = vpow2.f32 %v2514_v25 }
0x14f6   :  { %v2844_v7 = vpop.eup %2843 }
0x14f7   :  { %1808 = vrot.lane.b32.xlu0 %v2844_v7, %s2993_s28 }
0x14f8   :  { %v2846_v38 = vpop.eup %2845 }
0x14f9   :  { %v1802_v24 = vadd.f32 1.0, %v2846_v38 }
0x14fb   :  { %2847 = vrcp.f32 %v1802_v24 }
0x1505   :  { %v2848_v46 = vpop.eup %2847 }
0x1506   :  { %v1806_v40 = vmul.f32 %v2848_v46, %v3486_v30 }
0x1569   :  { %v1809_v50 = vpop.permute.xlu0 %1808 }
0x156a   :  { %v1811_v1 = vmul.f32 %v2848_v46, %v1809_v50 }
0x156c   :  { %1813 = vrot.lane.b32.xlu0 %v1811_v1, %s2994_s29 }
0x15de   :  { %v1814_v18 = vpop.permute.xlu0 %1813 }
0x15df   :  { %v1816_v63 = vadd.f32 %v1814_v18, %v1806_v40 }
0x15e1   :  { %2849 = vtanh.f32 %v1816_v63 }
0x15eb   :  { %v2850_v13 = vpop.eup %2849 }
0x15ec   :  { %1819 = vrot.lane.b32.xlu0 %v2850_v13, %s2993_s28 }
0x165e   :  { %v1820_v19 = vpop.permute.xlu0 %1819 }
0x165f   :  { %v1822_v37 = vmul.f32 %v2848_v46, %v1820_v19 }
0x1661   :  { %1824 = vrot.lane.b32.xlu0 %v1822_v37, %s2994_s29 }
0x1665   :  { %1827 = vrot.lane.b32.xlu0 %v3515_v4, %s2993_s28 }
0x16d3   :  { %v1825_v34 = vpop.permute.xlu0 %1824 }
0x16d7   :  { %v1828_v41 = vpop.permute.xlu0 %1827 }
0x16d8   :  { %v1830_v10 = vsel %vm170_vm8, %v1825_v34, %v1828_v41 }
0x16d9   :  { %2683 = vmatmul.mubr.msk.f32.vlgmr.msra.gmra.mrb[4].mxu1 %vm179_vm9, %v1830_v10 }
0x17ac   :  { %v1900_v30 = vpop.f32.mrb[4].mxu1 }
0x17ad   :  { %v1901_v8 = vadd.f32 %v2887_v61, %v1900_v30  ;;  %v2684_v22 = vpop.f32.mrb[5].mxu1 }
0x17af   :  { %2851 = vtanh.f32 %v1901_v8  ;;  %v2516_v59 = vmul.f32 -1.442695, %v1901_v8 }
0x17b1   :  { %2853 = vpow2.f32 %v2516_v59 }
0x17b9   :  { %v2852_v16 = vpop.eup %2851 }
0x17ba   :  { %1913 = vrot.lane.b32.xlu0 %v2852_v16, %s2993_s28 }
0x17bb   :  { %v2854_v4 = vpop.eup %2853 }
0x17bc   :  { %v1907_v57 = vadd.f32 1.0, %v2854_v4 }
0x17be   :  { %2855 = vrcp.f32 %v1907_v57 }
0x17c8   :  { %v2856_v55 = vpop.eup %2855 }
0x17c9   :  { %v1911_v12 = vmul.f32 %v2856_v55, %v3511_v56 }
0x182c   :  { %v1914_v43 = vpop.permute.xlu0 %1913 }
0x182d   :  { %v1916_v58 = vmul.f32 %v2856_v55, %v1914_v43 }
0x182f   :  { %1918 = vrot.lane.b32.xlu1 %v1916_v58, %s2994_s29 }
0x18a1   :  { %v1919_v17 = vpop.permute.xlu1 %1918 }
0x18a2   :  { %v1921_v60 = vadd.f32 %v1919_v17, %v1911_v12 }
0x18a4   :  { %2857 = vtanh.f32 %v1921_v60 }
0x18ae   :  { %v2858_v53 = vpop.eup %2857 }
0x18af   :  { %1924 = vrot.lane.b32.xlu0 %v2858_v53, %s2993_s28 }
0x1921   :  { %v1925_v47 = vpop.permute.xlu0 %1924 }
0x1922   :  { %v3698_v28 = vmul.f32 %v2856_v55, %v1925_v47 }
0x1924   :  { %v1929_v7 = vcombine.high %v3698_v28, %v3698_v28  ;;  %v1936_v25 = vrot.slane %v3698_v28, %v3268_v44 }
0x1926   :  { %v1943_v38 = vrot.slane %v1929_v7, %v3268_v44  ;;  %v1944_v24 = vcombine.high %v1936_v25, %v1936_v25  ;;  %v1952_v56 = vrot.slane %v1936_v25, %v3268_v44 }
0x1928   :  { %v1981_v46 = vrot.slane %v1952_v56, %v3277_v49  ;;  %v1945_v50 = vcombine.high %v1943_v38, %v1943_v38  ;;  %v1966_v1 = vrot.slane %v1944_v24, %v3268_v44  ;;  %v1974_v18 = vcombine.high %v1952_v56, %v1952_v56 }
0x1929   :  { %v1959_v37 = vrot.slane %v1943_v38, %v3268_v44 }
0x192a   :  { %2010 = vrot.lane.b32.xlu0 %v1981_v46, %s2994_s29  ;;  %v1976_v40 = vcombine.high %v1966_v1, %v1966_v1  ;;  %v1985_v63 = vrot.slane %v1966_v1, %v3277_v49  ;;  %v1973_v19 = vrot.slane %v1945_v50, %v3268_v44  ;;  %v1989_v34 = vrot.slane %v1974_v18, %v3277_v49 }
0x192b   :  { %v1997_v30 = vrot.slane %v1959_v37, %v3277_v49  ;;  %v1975_v61 = vcombine.high %v1959_v37, %v1959_v37 }
0x192c   :  { %v1993_v13 = vrot.slane %v1976_v40, %v3277_v49  ;;  %v2001_v41 = vrot.slane %v1973_v19, %v3277_v49  ;;  %v1977_v10 = vcombine.high %v1973_v19, %v1973_v19 }
0x192d   :  { %v2005_v44 = vrot.slane %v1975_v61, %v3277_v49 }
0x192e   :  { %2012 = vrot.lane.b32.xlu0 %v1985_v63, %s2994_s29  ;;  %2016 = vrot.lane.b32.xlu1 %v1993_v13, %s2994_s29  ;;  %v2009_v8 = vrot.slane %v1977_v10, %v3277_v49 }
0x1932   :  { %2014 = vrot.lane.b32.xlu0 %v1989_v34, %s2994_s29  ;;  %2020 = vrot.lane.b32.xlu1 %v2001_v41, %s2994_s29 }
0x1936   :  { %2018 = vrot.lane.b32.xlu0 %v1997_v30, %s2994_s29  ;;  %2024 = vrot.lane.b32.xlu1 %v2009_v8, %s2994_s29 }
0x193a   :  { %2022 = vrot.lane.b32.xlu0 %v2005_v44, %s2994_s29 }
0x199c   :  { %v2011_v22 = vpop.permute.xlu0 %2010 }
0x199d   :  { %v2034_v16 = vmul.f32 %v2011_v22, %v3300_v27 }
0x199f   :  { %v2042_v59 = vsel %vm170_vm8, %v2034_v16, 0.0 }
0x19a0   :  { %v2013_v4 = vpop.permute.xlu0 %2012  ;;  %2043 = vadd.xlane.f32.xlu0 %v2042_v59  ;;  %v2017_v55 = vpop.permute.xlu1 %2016 }
0x19a1   :  { %v2035_v57 = vmul.f32 %v2013_v4, %v3302_v29  ;;  %v2037_v60 = vmul.f32 %v2017_v55, %v3309_v45 }
0x19a3   :  { %v2045_v43 = vsel %vm170_vm8, %v2035_v57, 0.0  ;;  %v2051_v29 = vsel %vm170_vm8, %v2037_v60, 0.0 }
0x19a4   :  { %v2015_v58 = vpop.permute.xlu0 %2014  ;;  %2046 = vadd.xlane.f32.xlu1 %v2045_v43  ;;  %v2021_v17 = vpop.permute.xlu1 %2020 }
0x19a5   :  { %v2036_v12 = vmul.f32 %v2015_v58, %v3305_v33  ;;  %v2039_v7 = vmul.f32 %v2021_v17, %v3862_v5 }
0x19a7   :  { %v2048_v53 = vsel %vm170_vm8, %v2036_v12, 0.0  ;;  %v2057_v56 = vsel %vm170_vm8, %v2039_v7, 0.0 }
0x19a8   :  { %v2019_v47 = vpop.permute.xlu0 %2018  ;;  %2049 = vadd.xlane.f32.xlu0 %v2048_v53  ;;  %v2025_v38 = vpop.permute.xlu1 %2024 }
0x19a9   :  { %v2038_v27 = vmul.f32 %v2019_v47, %v3313_v52  ;;  %v2041_v45 = vmul.f32 %v2025_v38, %v3864_v35 }
0x19ab   :  { %v2054_v25 = vsel %vm170_vm8, %v2038_v27, 0.0  ;;  %v2063_v52 = vsel %vm170_vm8, %v2041_v45, 0.0 }
0x19ac   :  { %2052 = vadd.xlane.f32.xlu0 %v2051_v29  ;;  %v2023_v24 = vpop.permute.xlu0 %2022  ;;  %2055 = vadd.xlane.f32.xlu1 %v2054_v25 }
0x19ad   :  { %v2040_v33 = vmul.f32 %v2023_v24, %v3863_v0 }
0x19af   :  { %v2060_v46 = vsel %vm170_vm8, %v2040_v33, 0.0 }
0x19b0   :  { %2058 = vadd.xlane.f32.xlu0 %v2057_v56  ;;  %2061 = vadd.xlane.f32.xlu1 %v2060_v46 }
0x19b4   :  { %2064 = vadd.xlane.f32.xlu0 %v2063_v52 }
0x1a2d   :  { %v2044_v5 = vpop.xlane.xlu0 %2043 }
0x1a2e   :  { %v2077_v0 = vrot.slane %v2044_v5, %v3334_v36 }
0x1a31   :  { %v2047_v50 = vpop.xlane.xlu1 %2046 }
0x1a32   :  { %v2081_v40 = vrot.slane %v2047_v50, %v3334_v36 }
0x1a34   :  { %v2106_v13 = vsel %vm149_vm1, %v2081_v40, %v2077_v0 }
0x1a35   :  { %v2050_v1 = vpop.xlane.xlu0 %2049 }
0x1a36   :  { %v2085_v18 = vrot.slane %v2050_v1, %v3334_v36 }
0x1a38   :  { %v2107_v37 = vsel %vm152_vm2, %v2085_v18, %v2106_v13 }
0x1a39   :  { %v2053_v63 = vpop.xlane.xlu0 %2052  ;;  %v2056_v35 = vpop.xlane.xlu1 %2055 }
0x1a3a   :  { %v2089_v19 = vrot.slane %v2053_v63, %v3334_v36  ;;  %v2093_v34 = vrot.slane %v2056_v35, %v3334_v36 }
0x1a3c   :  { %v2108_v41 = vsel %vm155_vm3, %v2089_v19, %v2107_v37 }
0x1a3d   :  { %v2059_v10 = vpop.xlane.xlu0 %2058  ;;  %v2062_v30 = vpop.xlane.xlu1 %2061  ;;  %v2109_v8 = vsel %vm158_vm4, %v2093_v34, %v2108_v41 }
0x1a3e   :  { %v2097_v61 = vrot.slane %v2059_v10, %v3334_v36  ;;  %v2101_v44 = vrot.slane %v2062_v30, %v3334_v36 }
0x1a40   :  { %v2110_v22 = vsel %vm161_vm5, %v2097_v61, %v2109_v8 }
0x1a41   :  { %v2065_v16 = vpop.xlane.xlu0 %2064  ;;  %v2111_v4 = vsel %vm164_vm6, %v2101_v44, %v2110_v22 }
0x1a42   :  { %v2105_v59 = vrot.slane %v2065_v16, %v3334_v36 }
0x1a44   :  { %v2112_v57 = vsel %vm167_vm7, %v2105_v59, %v2111_v4 }
0x1a45   :  { %v2114_v55 = vsel %vm581_vm10, %v2112_v57, -inf }
0x1a46   :  { %2115 = vmax.xlane.f32.xlu1 %v2114_v55 }
0x1ad3   :  { %v2116_v43 = vpop.xlane.xlu1 %2115 }
0x1ad4   :  { %v2121_v58 = vrot.slane %v2116_v43, %v3277_v49  ;;  %v2125_v12 = vrot.slane %v2116_v43, %v3353_v31  ;;  %v2129_v17 = vrot.slane %v2116_v43, %v3356_v32  ;;  %v2133_v60 = vrot.slane %v2116_v43, %v3359_v42 }
0x1ad5   :  { %v2141_v53 = vrot.slane %v2116_v43, %v3369_v23  ;;  %v2137_v29 = vrot.slane %v2116_v43, %v3365_v62  ;;  %v2149_v33 = vrot.slane %v2116_v43, %v3377_v48  ;;  %v2145_v46 = vrot.slane %v2116_v43, %v3373_v39 }
0x1ad6   :  { %v2158_v47 = vsub.f32 %v2044_v5, %v2121_v58  ;;  %v2159_v27 = vsub.f32 %v2047_v50, %v2125_v12  ;;  %v2161_v7 = vsub.f32 %v2053_v63, %v2133_v60  ;;  %v2160_v25 = vsub.f32 %v2050_v1, %v2129_v17 }
0x1ad7   :  { %v2163_v45 = vsub.f32 %v2059_v10, %v2141_v53  ;;  %v2162_v52 = vsub.f32 %v2056_v35, %v2137_v29  ;;  %v2165_v18 = vsub.f32 %v2065_v16, %v2149_v33  ;;  %v2164_v50 = vsub.f32 %v2062_v30, %v2145_v46 }
0x1ad8   :  { %v2166_v38 = vmul.f32 1.442695, %v2158_v47  ;;  %v2168_v24 = vmul.f32 1.442695, %v2159_v27  ;;  %v2172_v56 = vmul.f32 1.442695, %v2161_v7 }
0x1ad9   :  { %v2170_v40 = vmul.f32 1.442695, %v2160_v25  ;;  %v2176_v5 = vmul.f32 1.442695, %v2163_v45  ;;  %v2174_v0 = vmul.f32 1.442695, %v2162_v52 }
0x1ada   :  { %2859 = vpow2.f32 %v2166_v38  ;;  %v2180_v1 = vmul.f32 1.442695, %v2165_v18  ;;  %v2178_v63 = vmul.f32 1.442695, %v2164_v50 }
0x1adb   :  { %2861 = vpow2.f32 %v2168_v24 }
0x1adc   :  { %2863 = vpow2.f32 %v2172_v56 }
0x1add   :  { %2865 = vpow2.f32 %v2170_v40 }
0x1ade   :  { %2867 = vpow2.f32 %v2176_v5 }
0x1adf   :  { %2869 = vpow2.f32 %v2174_v0 }
0x1ae0   :  { %2871 = vpow2.f32 %v2180_v1 }
0x1ae1   :  { %2873 = vpow2.f32 %v2178_v63 }
0x1ae4   :  { %v2860_v13 = vpop.eup %2859 }
0x1ae5   :  { %v2862_v19 = vpop.eup %2861  ;;  %2191 = vperm.xlu0 %2774, %v2860_v13  }
0x1ae6   :  { %2194 = vperm.xlu1 %2773, %v2862_v19   ;;  %v2864_v37 = vpop.eup %2863 }
0x1ae7   :  { %v2866_v35 = vpop.eup %2865 }
0x1ae8   :  { %v2868_v34 = vpop.eup %2867 }
0x1ae9   :  { %2200 = vperm.xlu0 %2774, %v2864_v37   ;;  %v2870_v41 = vpop.eup %2869 }
0x1aea   :  { %2197 = vperm.xlu1 %2773, %v2866_v35   ;;  %v2872_v10 = vpop.eup %2871 }
0x1aeb   :  { %v2874_v30 = vpop.eup %2873 }
0x1aed   :  { %2206 = vperm.xlu0 %2774, %v2868_v34  }
0x1aee   :  { %2203 = vperm.xlu1 %2773, %v2870_v41  }
0x1af1   :  { %2212 = vperm.xlu0 %2774, %v2872_v10  }
0x1af2   :  { %2209 = vperm.xlu1 %2773, %v2874_v30  }
0x1b64   :  { %v2192_v61 = vpop.permute.xlu0 %2191 }
0x1b65   :  { %v2195_v8 = vpop.permute.xlu1 %2194  ;;  %v2217_v22 = vrot.slane %v2192_v61, %v3334_v36 }
0x1b66   :  { %v2221_v44 = vrot.slane %v2195_v8, %v3334_v36 }
0x1b68   :  { %v2201_v16 = vpop.permute.xlu0 %2200  ;;  %v2246_v57 = vsel %vm149_vm1, %v2221_v44, %v2217_v22 }
0x1b69   :  { %v2198_v59 = vpop.permute.xlu1 %2197  ;;  %v2229_v55 = vrot.slane %v2201_v16, %v3334_v36 }
0x1b6a   :  { %v2225_v4 = vrot.slane %v2198_v59, %v3334_v36 }
0x1b6c   :  { %v2247_v43 = vsel %vm152_vm2, %v2225_v4, %v2246_v57  ;;  %v2207_v58 = vpop.permute.xlu0 %2206 }
0x1b6d   :  { %v2204_v12 = vpop.permute.xlu1 %2203  ;;  %v2248_v60 = vsel %vm155_vm3, %v2229_v55, %v2247_v43  ;;  %v2237_v53 = vrot.slane %v2207_v58, %v3334_v36 }
0x1b6e   :  { %v2233_v17 = vrot.slane %v2204_v12, %v3334_v36 }
0x1b70   :  { %v2249_v47 = vsel %vm158_vm4, %v2233_v17, %v2248_v60  ;;  %v2213_v27 = vpop.permute.xlu0 %2212 }
0x1b71   :  { %v2210_v7 = vpop.permute.xlu1 %2209  ;;  %v2245_v29 = vrot.slane %v2213_v27, %v3334_v36  ;;  %v2250_v38 = vsel %vm161_vm5, %v2237_v53, %v2249_v47 }
0x1b72   :  { %v2241_v25 = vrot.slane %v2210_v7, %v3334_v36 }
0x1b74   :  { %v2251_v24 = vsel %vm164_vm6, %v2241_v25, %v2250_v38 }
0x1b75   :  { %v2252_v33 = vsel %vm167_vm7, %v2245_v29, %v2251_v24 }
0x1b76   :  { %v2254_v45 = vsel %vm581_vm10, %v2252_v33, 0.0 }
0x1b77   :  { %2255 = vadd.xlane.f32.xlu1 %v2254_v45 }
0x1c04   :  { %v2256_v56 = vpop.xlane.xlu1 %2255 }
0x1c05   :  { %2875 = vrcp.f32 %v2256_v56 }
0x1c0f   :  { %v2876_v46 = vpop.eup %2875 }
0x1c10   :  { %v2266_v52 = vrot.slane %v2876_v46, %v3353_v31  ;;  %v2270_v18 = vrot.slane %v2876_v46, %v3356_v32  ;;  %v2262_v50 = vrot.slane %v2876_v46, %v3277_v49  ;;  %v2274_v1 = vrot.slane %v2876_v46, %v3359_v42 }
0x1c11   :  { %v2278_v61 = vrot.slane %v2876_v46, %v3365_v62  ;;  %v2282_v44 = vrot.slane %v2876_v46, %v3369_v23  ;;  %v2286_v32 = vrot.slane %v2876_v46, %v3373_v39  ;;  %v2290_v49 = vrot.slane %v2876_v46, %v3377_v48 }
0x1c12   :  { %v2300_v40 = vmul.f32 %v2862_v19, %v2266_v52  ;;  %v2301_v5 = vmul.f32 %v2866_v35, %v2270_v18  ;;  %v2299_v0 = vmul.f32 %v2860_v13, %v2262_v50  ;;  %v2302_v63 = vmul.f32 %v2864_v37, %v2274_v1 }
0x1c13   :  { %v2303_v8 = vmul.f32 %v2870_v41, %v2278_v61  ;;  %v2304_v31 = vmul.f32 %v2868_v34, %v2282_v44  ;;  %v2305_v19 = vmul.f32 %v2874_v30, %v2286_v32  ;;  %v2306_v13 = vmul.f32 %v2872_v10, %v2290_v49 }
0x1c14   :  { %2314 = vperm.xlu0 %2774, %v2300_v40   ;;  %v2475_v62 = vrot.slane %v3615_v11, %v3334_v36  ;;  %v2470_v39 = vrot.slane %v3414_v9, %v3334_v36 }
0x1c18   :  { %2319 = vperm.xlu0 %2774, %v2301_v5  }
0x1c1c   :  { %2309 = vperm.xlu0 %2774, %v2299_v0  }
0x1c20   :  { %2324 = vperm.xlu0 %2774, %v2302_v63  }
0x1c24   :  { %2329 = vperm.xlu0 %2774, %v2303_v8  }
0x1c28   :  { %2334 = vperm.xlu0 %2774, %v2304_v31  }
0x1c2c   :  { %2339 = vperm.xlu0 %2774, %v2305_v19  }
0x1c30   :  { %2344 = vperm.xlu0 %2774, %v2306_v13  }
0x1c93   :  { %v2315_v42 = vpop.permute.xlu0 %2314 }
0x1c94   :  { %v2348_v37 = vmul.f32 %v3608_v2, %v2315_v42  ;;  %v2483_v2 = vsel %vm2482_vm11, %v2470_v39, %v2475_v62 }
0x1c96   :  { %v2362_v34 = vsel %vm170_vm8, %v2348_v37, 0.0 }
0x1c97   :  { %v2320_v35 = vpop.permute.xlu0 %2319  ;;  %v2363_v30 = vrot.slane %v2362_v34, 4 }
0x1c98   :  { %v2349_v23 = vmul.f32 %v3612_v15, %v2320_v35 }
0x1c99   :  { %v2364_v57 = vadd.f32 %v2363_v30, %v2362_v34 }
0x1c9a   :  { %v2369_v22 = vsel %vm170_vm8, %v2349_v23, 0.0 }
0x1c9b   :  { %v2310_v48 = vpop.permute.xlu0 %2309  ;;  %v2370_v59 = vrot.slane %v2369_v22, 4  ;;  %v2365_v17 = vrot.slane %v2364_v57, 2 }
0x1c9c   :  { %v2347_v41 = vmul.f32 %v3617_v54, %v2310_v48  ;;  %v2480_v10 = vrot.slane %v2310_v48, %v3334_v36 }
0x1c9d   :  { %v2371_v58 = vadd.f32 %v2370_v59, %v2369_v22  ;;  %v2366_v38 = vadd.f32 %v2365_v17, %v2364_v57 }
0x1c9e   :  { %v2355_v11 = vsel %vm170_vm8, %v2347_v41, 0.0  ;;  %v2485_v15 = vsel %vm2484_vm12, %v2483_v2, %v2480_v10  ;;  %v2888_v41 = vld [vmem:[%s3841_s8] ss:$0 sm:$0xff]  ;;  %s2998_s8 = smov 1  }
0x1c9f   :  { %v2356_v16 = vrot.slane %v2355_v11, 4  ;;  %2487 = vst.msk [vmem:[%s3844_s11] sm:$0x7] %vm2486_vm13, %v2485_v15  ;;  %v2325_v9 = vpop.permute.xlu0 %2324  ;;  %v2372_v25 = vrot.slane %v2371_v58, 2  ;;  %v2367_v5 = vrot.slane %v2366_v38, 1 }
0x1ca0   :  { %v2350_v4 = vmul.f32 %v3623_v26, %v2325_v9 }
0x1ca1   :  { %v2357_v54 = vadd.f32 %v2356_v16, %v2355_v11  ;;  %v2373_v40 = vadd.f32 %v2372_v25, %v2371_v58  ;;  %v2368_v49 = vadd.f32 %v2367_v5, %v2366_v38  ;;  %v2889_v5 = vld [vmem:[#allocation2] ss:$0 sm:$0xff] }
0x1ca2   :  { %v2376_v36 = vsel %vm170_vm8, %v2350_v4, 0.0 }
0x1ca3   :  { %v2377_v55 = vrot.slane %v2376_v36, 4  ;;  %v2330_v43 = vpop.permute.xlu0 %2329  ;;  %v2358_v53 = vrot.slane %v2357_v54, 2  ;;  %v2374_v31 = vrot.slane %v2373_v40, 1  ;;  %v2413_v10 = vmul.f32 %v2888_v41, %v2368_v49 }
0x1ca4   :  { %v2351_v12 = vmul.f32 %v3627_v21, %v2330_v43 }
0x1ca5   :  { %v2378_v60 = vadd.f32 %v2377_v55, %v2376_v36  ;;  %v2359_v33 = vadd.f32 %v2358_v53, %v2357_v54  ;;  %v2375_v39 = vadd.f32 %v2374_v31, %v2373_v40  ;;  %v2428_v4 = vrot.slane %v2413_v10, 7 }
0x1ca6   :  { %v2383_v47 = vsel %vm170_vm8, %v2351_v12, 0.0 }
0x1ca7   :  { %v2379_v27 = vrot.slane %v2378_v60, 2  ;;  %v2384_v7 = vrot.slane %v2383_v47, 4  ;;  %v2335_v29 = vpop.permute.xlu0 %2334  ;;  %v2360_v1 = vrot.slane %v2359_v33, 1  ;;  %v2414_v9 = vmul.f32 %v2888_v41, %v2375_v39 }
0x1ca8   :  { %v2352_v26 = vmul.f32 %v3631_v20, %v2335_v29 }
0x1ca9   :  { %v2385_v24 = vadd.f32 %v2384_v7, %v2383_v47  ;;  %v2380_v56 = vadd.f32 %v2379_v27, %v2378_v60  ;;  %v2361_v37 = vadd.f32 %v2360_v1, %v2359_v33  ;;  %v2430_v17 = vrot.slane %v2414_v9, 6 }
0x1caa   :  { %v2390_v45 = vsel %vm170_vm8, %v2352_v26, 0.0 }
0x1cab   :  { %v2386_v46 = vrot.slane %v2385_v24, 2  ;;  %v2391_v52 = vrot.slane %v2390_v45, 4  ;;  %v2340_v21 = vpop.permute.xlu0 %2339  ;;  %v2381_v61 = vrot.slane %v2380_v56, 1  ;;  %v2412_v22 = vmul.f32 %v2888_v41, %v2361_v37 }
0x1cac   :  { %v2353_v18 = vmul.f32 %v3635_v3, %v2340_v21 }
0x1cad   :  { %v2387_v50 = vadd.f32 %v2386_v46, %v2385_v24  ;;  %v2392_v0 = vadd.f32 %v2391_v52, %v2390_v45  ;;  %v2382_v35 = vadd.f32 %v2381_v61, %v2380_v56  ;;  %v2429_v55 = vsel %vm149_vm1, %v2428_v4, %v2412_v22 }
0x1cae   :  { %v2397_v63 = vsel %vm170_vm8, %v2353_v18, 0.0  ;;  %v2431_v7 = vsel %vm152_vm2, %v2430_v17, %v2429_v55  ;;  %v2411_v56 = vmul.f32 %v3698_v28, %v3469_v6  ;;  %v3865_v6 = vld [vmem:[#allocation16_spill] sm:$0xff] }
0x1caf   :  { %v2393_v20 = vrot.slane %v2392_v0, 2  ;;  %v2398_v8 = vrot.slane %v2397_v63, 4  ;;  %v2345_v44 = vpop.permute.xlu0 %2344  ;;  %v2388_v32 = vrot.slane %v2387_v50, 1  ;;  %v2415_v11 = vmul.f32 %v2888_v41, %v2382_v35 }
0x1cb0   :  { %v2354_v19 = vmul.f32 %v3639_v51, %v2345_v44 }
0x1cb1   :  { %v2394_v13 = vadd.f32 %v2393_v20, %v2392_v0  ;;  %v2399_v42 = vadd.f32 %v2398_v8, %v2397_v63  ;;  %v2389_v48 = vadd.f32 %v2388_v32, %v2387_v50  ;;  %v2432_v43 = vrot.slane %v2415_v11, 5 }
0x1cb2   :  { %v2404_v3 = vsel %vm170_vm8, %v2354_v19, 0.0 }
0x1cb3   :  { %v2395_v62 = vrot.slane %v2394_v13, 1  ;;  %v2400_v23 = vrot.slane %v2399_v42, 2  ;;  %v2405_v34 = vrot.slane %v2404_v3, 4  ;;  %v2416_v59 = vmul.f32 %v2888_v41, %v2389_v48 }
0x1cb4   :  { %v2433_v25 = vsel %vm155_vm3, %v2432_v43, %v2431_v7 }
0x1cb5   :  { %v2396_v2 = vadd.f32 %v2395_v62, %v2394_v13  ;;  %v2401_v30 = vadd.f32 %v2400_v23, %v2399_v42  ;;  %v2406_v51 = vadd.f32 %v2405_v34, %v2404_v3  ;;  %v2434_v60 = vrot.slane %v2416_v59, 4 }
0x1cb7   :  { %v2402_v15 = vrot.slane %v2401_v30, 1  ;;  %v2407_v16 = vrot.slane %v2406_v51, 2  ;;  %v2417_v57 = vmul.f32 %v2888_v41, %v2396_v2  ;;  %v2435_v26 = vsel %vm158_vm4, %v2434_v60, %v2433_v25 }
0x1cb9   :  { %v2403_v54 = vadd.f32 %v2402_v15, %v2401_v30  ;;  %v2408_v36 = vadd.f32 %v2407_v16, %v2406_v51  ;;  %v2436_v53 = vrot.slane %v2417_v57, 3 }
0x1cbb   :  { %v2418_v58 = vmul.f32 %v2888_v41, %v2403_v54  ;;  %v2409_v12 = vrot.slane %v2408_v36, 1  ;;  %v2437_v38 = vsel %vm161_vm5, %v2436_v53, %v2435_v26 }
0x1cbd   :  { %v2410_v47 = vadd.f32 %v2409_v12, %v2408_v36  ;;  %v2438_v27 = vrot.slane %v2418_v58, 2 }
0x1cbf   :  { %v2419_v29 = vmul.f32 %v2888_v41, %v2410_v47  ;;  %v2439_v33 = vsel %vm164_vm6, %v2438_v27, %v2437_v38 }
0x1cc1   :  { %v2440_v24 = vrot.slane %v2419_v29, 1 }
0x1cc3   :  { %v2441_v45 = vsel %vm167_vm7, %v2440_v24, %v2439_v33 }
0x1cc4   :  { %2442 = vrot.lane.b32.xlu0 %v2441_v45, %s2997_s17 }
0x1d36   :  { %v2443_v46 = vpop.permute.xlu0 %2442 }
0x1d37   :  { %v2445_v52 = vadd.f32 %v2443_v46, %v2411_v56 }
0x1d39   :  { %2447 = vrot.lane.b32.xlu1 %v2445_v52, %s2994_s29 }
0x1d3d   :  { %2454 = vrot.lane.b32.xlu1 %v3673_v14, %s2998_s8 }
0x1dab   :  { %v2448_v21 = vpop.permute.xlu1 %2447 }
0x1dac   :  { %v2450_v40 = vsel %vm170_vm8, %v2448_v21, 0.0 }
0x1dad   :  { %2451 = vadd.xlane.f32.xlu0 %v2450_v40 }
0x1daf   :  { %v2455_v0 = vpop.permute.xlu1 %2454 }
0x1db0   :  { %v2462_v28 = vsel %vm2461_vm14, %v3865_v6, %v2455_v0 }
0x1e3a   :  { %v2452_v18 = vpop.xlane.xlu0 %2451 }
0x1e3b   :  { %v2453_v50 = vadd.f32 %v2889_v5, %v2452_v18 }
0x1e3d   :  { %2458 = vrot.lane.b32.xlu1 %v2453_v50, %s2999_s1 }
0x1eaf   :  { %v2459_v1 = vpop.permute.xlu1 %2458 }
0x1eb0   :  { %v2464_v63 = vsel %vm2463_vm15, %v2462_v28, %v2459_v1 }
0x1eb1   :  { %2466 = vst.msk [vmem:[%s3843_s10] sm:$0xff] %vm2465_vm0, %v2464_v63 }
0x1eb2   :  { %2496 = vsyncpa [#allocation4], 1 }
0x1eb3   :  { %2497 = vsyncpa [#allocation6], 1 }
0x1eb4   :  { %2498 = vsyncpa [#allocation9], 1 }

</bundles_post_ra>
